<compile_context>
chip_gen: v6e
topology: v6e:2x2x1
jax: 0.10.0
libtpu: 0.0.40
codegen_flags: <defaults>
</compile_context>

<pallas_src>
import functools

import jax
import jax.numpy as jnp
from jax.experimental import pallas as pl
from jax.experimental.pallas import tpu as pltpu


# ----------------------------- in-kernel helpers ---------------------------

def _layer_norm(x, gamma, beta, eps=1e-5):
    # x: (rows, C) f32; gamma/beta: (1, C) f32
    mu = jnp.mean(x, axis=-1, keepdims=True)
    xc = x - mu
    var = jnp.mean(xc * xc, axis=-1, keepdims=True)
    return xc * jax.lax.rsqrt(var + eps) * gamma + beta


def _erf_poly(x):
    # Abramowitz & Stegun 7.1.26 polynomial approximation of erf (|err| < 1.5e-7).
    a1, a2, a3, a4, a5 = (0.254829592, -0.284496736, 1.421413741,
                          -1.453152027, 1.061405429)
    p = 0.3275911
    s = jnp.sign(x)
    ax = jnp.abs(x)
    t = pl.reciprocal(1.0 + p * ax, approx=True)        # EUP, not VALU divide
    poly = ((((a5 * t + a4) * t + a3) * t + a2) * t + a1) * t
    return s * (1.0 - poly * jnp.exp(-ax * ax))


def _gelu_exact(x):
    # exact (erf-based) GELU, matching torch.nn.GELU() default
    return 0.5 * x * (1.0 + _erf_poly(x * 0.7071067811865476))


# ------------------------ kernel A: LN1 + QKV projection --------------------

def qkv_kernel(num_heads, scale,
               x_ref, ln1g_ref, ln1b_ref, wq_ref, wk_ref, wv_ref,
               q_out_ref, k_out_ref, v_out_ref):
    x = x_ref[0]                                   # (tR, C) f32
    C = x.shape[-1]
    D = C // num_heads

    xn = _layer_norm(x, ln1g_ref[...], ln1b_ref[...]).astype(jnp.bfloat16)

    # bf16 operands, f32 accumulation on the MXU.
    q = jnp.dot(xn, wq_ref[...], preferred_element_type=jnp.float32)
    # Fold the attention scale D**-0.5 into q (in f32, before the bf16 cast).
    q = q * scale
    k = jnp.dot(xn, wk_ref[...], preferred_element_type=jnp.float32)
    v = jnp.dot(xn, wv_ref[...], preferred_element_type=jnp.float32)

    # Write q/k/v out in head-major layout (B, H, N, D) so the attention kernel
    # needs no in-kernel reshapes/transposes. Static per-head lane slices here
    # are confined to this cheap projection kernel.
    for h in range(num_heads):
        sl = slice(h * D, (h + 1) * D)
        q_out_ref[0, h] = q[:, sl].astype(jnp.bfloat16)
        k_out_ref[0, h] = k[:, sl].astype(jnp.bfloat16)
        v_out_ref[0, h] = v[:, sl].astype(jnp.bfloat16)


# -------------- kernel B: flash attention + proj + residual + MLP -----------

def attn_mlp_kernel(num_heads,
                    x_ref, q_ref, k_ref, v_ref,
                    wp_ref, bp_ref, ln2g_ref, ln2b_ref,
                    w1_ref, b1_ref, w2_ref, b2_ref,
                    out_ref,
                    m_sc, l_sc, acc_sc, o_sc):
    j = pl.program_id(2)                           # kv-chunk index (reduction)

    @pl.when(j == 0)
    def _init():
        m_sc[...] = jnp.full(m_sc.shape, -jnp.inf, jnp.float32)
        l_sc[...] = jnp.zeros(l_sc.shape, jnp.float32)
        acc_sc[...] = jnp.zeros(acc_sc.shape, jnp.float32)

    q = q_ref[0]                                   # (H, tQ, D) bf16 (pre-scaled)
    k = k_ref[0]                                   # (H, tK, D) bf16
    v = v_ref[0]                                   # (H, tK, D) bf16

    # Batched-over-heads contraction; contracts the last dims directly (no .T).
    s = jnp.einsum("hqd,hkd->hqk", q, k,
                   preferred_element_type=jnp.float32)       # (H, tQ, tK) f32

    # Online (flash) softmax update in f32.
    m_prev = m_sc[...]
    m_new = jnp.maximum(m_prev, jnp.max(s, axis=-1, keepdims=True))
    alpha = jnp.exp(m_prev - m_new)
    p = jnp.exp(s - m_new)
    l_sc[...] = alpha * l_sc[...] + jnp.sum(p, axis=-1, keepdims=True)
    acc_sc[...] = alpha * acc_sc[...] + jnp.einsum(
        "hqk,hkd->hqd", p.astype(jnp.bfloat16), v,
        preferred_element_type=jnp.float32)
    m_sc[...] = m_new

    @pl.when(j == pl.num_programs(2) - 1)
    def _finalize():
        D = q_ref.shape[-1]
        # Normalize and scatter heads back to (tQ, C) at their lane offsets.
        o = acc_sc[...] * pl.reciprocal(l_sc[...], approx=True)  # (H, tQ, D) f32
        for h in range(num_heads):
            o_sc[:, h * D:(h + 1) * D] = o[h].astype(jnp.bfloat16)

        attn = jnp.dot(o_sc[...], wp_ref[...],
                       preferred_element_type=jnp.float32) + bp_ref[...]
        x1 = x_ref[0] + attn                                   # residual, f32

        xn2 = _layer_norm(x1, ln2g_ref[...], ln2b_ref[...])
        h1 = jnp.dot(xn2.astype(jnp.bfloat16), w1_ref[...],
                     preferred_element_type=jnp.float32) + b1_ref[...]
        h1 = _gelu_exact(h1)
        mlp = jnp.dot(h1.astype(jnp.bfloat16), w2_ref[...],
                      preferred_element_type=jnp.float32) + b2_ref[...]

        out_ref[0] = (x1 + mlp).astype(out_ref.dtype)


# --------------------------------- wrapper ----------------------------------

def block_forward(x, params, num_heads, *, seq_tile=128, kv_tile=128):
    B, N, C = x.shape
    D = C // num_heads
    Hm = params["w1_t"].shape[1]

    tR = min(seq_tile, N)       # row tile for the projection kernel
    tQ = min(seq_tile, N)       # query-row tile
    tK = min(kv_tile, N)        # key/value chunk
    assert N % tR == 0 and N % tQ == 0 and N % tK == 0, "N must be tileable"

    bf16 = jnp.bfloat16
    wq = params["wq_t"].astype(bf16)
    wk = params["wkv_t"][:, :C].astype(bf16)
    wv = params["wkv_t"][:, C:].astype(bf16)
    wp = params["wp_t"].astype(bf16)
    w1 = params["w1_t"].astype(bf16)
    w2 = params["w2_t"].astype(bf16)

    vmem_limit = 64 * 1024 * 1024

    # ---- kernel A: LN1 + q/k/v projections (row-tiled, fully parallel) -----
    cfullA = lambda shape: pl.BlockSpec(shape, lambda b, i: (0,) * len(shape))
    head_out_spec = pl.BlockSpec((1, num_heads, tR, D), lambda b, i: (b, 0, i, 0))
    q, k, v = pl.pallas_call(
        functools.partial(qkv_kernel, num_heads, D ** -0.5),
        out_shape=[jax.ShapeDtypeStruct((B, num_heads, N, D), bf16)] * 3,
        grid=(B, N // tR),
        in_specs=[
            pl.BlockSpec((1, tR, C), lambda b, i: (b, i, 0)),   # x rows
            cfullA((1, C)), cfullA((1, C)),                     # ln1 gamma/beta
            cfullA((C, C)), cfullA((C, C)), cfullA((C, C)),     # Wq^T, Wk^T, Wv^T
        ],
        out_specs=[head_out_spec, head_out_spec, head_out_spec],
        compiler_params=pltpu.CompilerParams(
            dimension_semantics=("parallel", "parallel"),
            vmem_limit_bytes=vmem_limit),
    )(x, params["ln1_g"], params["ln1_b"], wq, wk, wv)

    # ---- kernel B: flash attention + proj + residual + LN2 + MLP -----------
    # NOTE: constant-index weight blocks could use pipeline_mode=pl.Buffered(1)
    # on v7x to avoid double-buffering ~2x the weight VMEM footprint.
    cfullB = lambda shape: pl.BlockSpec(shape, lambda b, i, j: (0,) * len(shape))
    out = pl.pallas_call(
        functools.partial(attn_mlp_kernel, num_heads),
        out_shape=jax.ShapeDtypeStruct((B, N, C), jnp.float32),
        grid=(B, N // tQ, N // tK),
        in_specs=[
            pl.BlockSpec((1, tQ, C), lambda b, i, j: (b, i, 0)),                # x
            pl.BlockSpec((1, num_heads, tQ, D), lambda b, i, j: (b, 0, i, 0)),  # q
            pl.BlockSpec((1, num_heads, tK, D), lambda b, i, j: (b, 0, j, 0)),  # k
            pl.BlockSpec((1, num_heads, tK, D), lambda b, i, j: (b, 0, j, 0)),  # v
            cfullB((C, C)), cfullB((1, C)),      # Wproj^T, bproj
            cfullB((1, C)), cfullB((1, C)),      # ln2 gamma/beta
            cfullB((C, Hm)), cfullB((1, Hm)),    # W1^T, b1
            cfullB((Hm, C)), cfullB((1, C)),     # W2^T, b2
        ],
        out_specs=pl.BlockSpec((1, tQ, C), lambda b, i, j: (b, i, 0)),
        scratch_shapes=[
            pltpu.VMEM((num_heads, tQ, 1), jnp.float32),    # running max m
            pltpu.VMEM((num_heads, tQ, 1), jnp.float32),    # running sum l
            pltpu.VMEM((num_heads, tQ, D), jnp.float32),    # output accumulator
            pltpu.VMEM((tQ, C), jnp.bfloat16),              # merged-head buffer
        ],
        compiler_params=pltpu.CompilerParams(
            dimension_semantics=("parallel", "parallel", "arbitrary"),
            vmem_limit_bytes=vmem_limit),
    )(x, q, k, v,
      wp, params["bp"], params["ln2_g"], params["ln2_b"],
      w1, params["b1"], w2, params["b2"])
    return out


# ---------------------------- pure-JAX reference ----------------------------

def block_reference(x, params, num_heads):
    B, N, C = x.shape
    D = C // num_heads

    def ln(v, g, b, eps=1e-5):
        mu = jnp.mean(v, axis=-1, keepdims=True)
        var = jnp.mean((v - mu) ** 2, axis=-1, keepdims=True)
        return (v - mu) / jnp.sqrt(var + eps) * g + b

    xn = ln(x, params["ln1_g"], params["ln1_b"])
    q = xn @ params["wq_t"]
    kv = xn @ params["wkv_t"]
    k, v = kv[..., :C], kv[..., C:]
    q = q.reshape(B, N, num_heads, D).transpose(0, 2, 1, 3)
    k = k.reshape(B, N, num_heads, D).transpose(0, 2, 1, 3)
    v = v.reshape(B, N, num_heads, D).transpose(0, 2, 1, 3)
    attn = jnp.einsum("bhnd,bhmd->bhnm", q, k) * (D ** -0.5)
    attn = jax.nn.softmax(attn, axis=-1)
    o = jnp.einsum("bhnm,bhmd->bhnd", attn, v)
    o = o.transpose(0, 2, 1, 3).reshape(B, N, C)
    o = o @ params["wp_t"] + params["bp"]
    x1 = x + o
    xn2 = ln(x1, params["ln2_g"], params["ln2_b"])
    h = jax.nn.gelu(xn2 @ params["w1_t"] + params["b1"], approximate=False)
    m = h @ params["w2_t"] + params["b2"]
    return x1 + m


# ----------------------------------- main ------------------------------------

if __name__ == "__main__":
    # Lane-friendly demo shapes: C multiple of 128, N multiple of the tiles.
    B, N, C = 2, 256, 128
    num_heads = 4
    mlp_ratio = 4.0
    Hm = int(C * mlp_ratio)

    key = jax.random.PRNGKey(0)
    ks = jax.random.split(key, 9)

    # Linear layers stored pre-transposed (in_dim, out_dim): y = x @ W_T + b.
    params = {
        "ln1_g": jnp.ones((1, C), jnp.float32),
        "ln1_b": jnp.zeros((1, C), jnp.float32),
        "wq_t":  0.05 * jax.random.normal(ks[0], (C, C), jnp.float32),
        "wkv_t": 0.05 * jax.random.normal(ks[1], (C, 2 * C), jnp.float32),
        "wp_t":  0.05 * jax.random.normal(ks[2], (C, C), jnp.float32),
        "bp":    0.01 * jax.random.normal(ks[3], (1, C), jnp.float32),
        "ln2_g": jnp.ones((1, C), jnp.float32),
        "ln2_b": jnp.zeros((1, C), jnp.float32),
        "w1_t":  0.05 * jax.random.normal(ks[4], (C, Hm), jnp.float32),
        "b1":    0.01 * jax.random.normal(ks[5], (1, Hm), jnp.float32),
        "w2_t":  0.05 * jax.random.normal(ks[6], (Hm, C), jnp.float32),
        "b2":    0.01 * jax.random.normal(ks[7], (1, C), jnp.float32),
    }

    x = jax.random.normal(ks[8], (B, N, C), jnp.float32)

    out = block_forward(x, params, num_heads, seq_tile=128, kv_tile=128)
    out = jax.block_until_ready(out)

    ref = block_reference(x, params, num_heads)
    assert out.shape == (B, N, C)
    # Tolerance accounts for bf16 MXU operands (f32 accumulation) vs f32 reference.
    assert jnp.allclose(out, ref, atol=4e-2, rtol=4e-2), "mismatch vs reference"

    print("KERNEL_OK")
</pallas_src>

<mosaic_0001>
module attributes {stable_mosaic.version = 11 : i64} {
  func.func @qkv_kernel(%arg0: i32, %arg1: i32, %arg2: memref<1x128x128xf32, #tpu.memory_space<vmem>>, %arg3: memref<1x128xf32, #tpu.memory_space<vmem>>, %arg4: memref<1x128xf32, #tpu.memory_space<vmem>>, %arg5: memref<128x128xbf16, #tpu.memory_space<vmem>>, %arg6: memref<128x128xbf16, #tpu.memory_space<vmem>>, %arg7: memref<128x128xbf16, #tpu.memory_space<vmem>>, %arg8: memref<1x4x128x32xbf16, #tpu.memory_space<vmem>>, %arg9: memref<1x4x128x32xbf16, #tpu.memory_space<vmem>>, %arg10: memref<1x4x128x32xbf16, #tpu.memory_space<vmem>>) attributes {dimension_semantics = [#tpu.dimension_semantics<parallel>, #tpu.dimension_semantics<parallel>], iteration_bounds = array<i64: 2, 2>, scalar_prefetch = 0 : i64, scratch_operands = 0 : i64, tpu.core_type = #tpu.core_type<tc>, window_params = [{transform_indices = @transform_0, window_bounds = array<i64: 1, 128, 128>}, {pipeline_mode = #tpu.pipeline_mode<synchronous>, transform_indices = @transform_1, window_bounds = array<i64: 1, 128>}, {pipeline_mode = #tpu.pipeline_mode<synchronous>, transform_indices = @transform_2, window_bounds = array<i64: 1, 128>}, {pipeline_mode = #tpu.pipeline_mode<synchronous>, transform_indices = @transform_3, window_bounds = array<i64: 128, 128>}, {pipeline_mode = #tpu.pipeline_mode<synchronous>, transform_indices = @transform_4, window_bounds = array<i64: 128, 128>}, {pipeline_mode = #tpu.pipeline_mode<synchronous>, transform_indices = @transform_5, window_bounds = array<i64: 128, 128>}, {transform_indices = @transform_6, window_bounds = array<i64: 1, 4, 128, 32>}, {transform_indices = @transform_7, window_bounds = array<i64: 1, 4, 128, 32>}, {transform_indices = @transform_8, window_bounds = array<i64: 1, 4, 128, 32>}]} {
    %c0 = arith.constant 0 : index
    %c0_0 = arith.constant 0 : index
    %c0_1 = arith.constant 0 : index
    %0 = vector.load %arg2[%c0, %c0_0, %c0_1] : memref<1x128x128xf32, #tpu.memory_space<vmem>>, vector<1x128x128xf32>
    %1 = vector.shape_cast %0 : vector<1x128x128xf32> to vector<128x128xf32>
    %c0_2 = arith.constant 0 : index
    %c0_3 = arith.constant 0 : index
    %2 = vector.load %arg3[%c0_2, %c0_3] : memref<1x128xf32, #tpu.memory_space<vmem>>, vector<1x128xf32>
    %c0_4 = arith.constant 0 : index
    %c0_5 = arith.constant 0 : index
    %3 = vector.load %arg4[%c0_4, %c0_5] : memref<1x128xf32, #tpu.memory_space<vmem>>, vector<1x128xf32>
    %cst = arith.constant dense<0.000000e+00> : vector<128xf32>
    %4 = vector.multi_reduction <add>, %1, %cst [1] : vector<128x128xf32> to vector<128xf32>
    %5 = vector.shape_cast %4 : vector<128xf32> to vector<128x1xf32>
    %cst_6 = arith.constant 1.280000e+02 : f32
    %6 = vector.broadcast %cst_6 : f32 to vector<128x1xf32>
    %7 = arith.divf %5, %6 : vector<128x1xf32>
    %8 = vector.broadcast %7 : vector<128x1xf32> to vector<128x128xf32>
    %9 = arith.subf %1, %8 : vector<128x128xf32>
    %10 = arith.mulf %9, %9 : vector<128x128xf32>
    %cst_7 = arith.constant dense<0.000000e+00> : vector<128xf32>
    %11 = vector.multi_reduction <add>, %10, %cst_7 [1] : vector<128x128xf32> to vector<128xf32>
    %12 = vector.shape_cast %11 : vector<128xf32> to vector<128x1xf32>
    %cst_8 = arith.constant 1.280000e+02 : f32
    %13 = vector.broadcast %cst_8 : f32 to vector<128x1xf32>
    %14 = arith.divf %12, %13 : vector<128x1xf32>
    %cst_9 = arith.constant 9.99999974E-6 : f32
    %15 = vector.broadcast %cst_9 : f32 to vector<128x1xf32>
    %16 = arith.addf %14, %15 : vector<128x1xf32>
    %17 = math.rsqrt %16 : vector<128x1xf32>
    %18 = vector.broadcast %17 : vector<128x1xf32> to vector<128x128xf32>
    %19 = arith.mulf %9, %18 : vector<128x128xf32>
    %20 = vector.broadcast %2 : vector<1x128xf32> to vector<128x128xf32>
    %21 = arith.mulf %19, %20 : vector<128x128xf32>
    %22 = vector.broadcast %3 : vector<1x128xf32> to vector<128x128xf32>
    %23 = arith.addf %21, %22 : vector<128x128xf32>
    %24 = arith.truncf %23 : vector<128x128xf32> to vector<128x128xbf16>
    %c0_10 = arith.constant 0 : index
    %c0_11 = arith.constant 0 : index
    %25 = vector.load %arg5[%c0_10, %c0_11] : memref<128x128xbf16, #tpu.memory_space<vmem>>, vector<128x128xbf16>
    %cst_12 = arith.constant dense<0.000000e+00> : vector<128x128xf32>
    %26 = tpu.matmul %24, %25, %cst_12 {dimension_numbers = #tpu.dot_dimension_numbers<[1], [0], [0], [1], [0, 0, 1, 1], [], []>} : vector<128x128xbf16>, vector<128x128xbf16>, vector<128x128xf32> -> vector<128x128xf32>
    %cst_13 = arith.constant 0.176776692 : f32
    %27 = vector.broadcast %cst_13 : f32 to vector<128x128xf32>
    %28 = arith.mulf %26, %27 : vector<128x128xf32>
    %c0_14 = arith.constant 0 : index
    %c0_15 = arith.constant 0 : index
    %29 = vector.load %arg6[%c0_14, %c0_15] : memref<128x128xbf16, #tpu.memory_space<vmem>>, vector<128x128xbf16>
    %cst_16 = arith.constant dense<0.000000e+00> : vector<128x128xf32>
    %30 = tpu.matmul %24, %29, %cst_16 {dimension_numbers = #tpu.dot_dimension_numbers<[1], [0], [0], [1], [0, 0, 1, 1], [], []>} : vector<128x128xbf16>, vector<128x128xbf16>, vector<128x128xf32> -> vector<128x128xf32>
    %c0_17 = arith.constant 0 : index
    %c0_18 = arith.constant 0 : index
    %31 = vector.load %arg7[%c0_17, %c0_18] : memref<128x128xbf16, #tpu.memory_space<vmem>>, vector<128x128xbf16>
    %cst_19 = arith.constant dense<0.000000e+00> : vector<128x128xf32>
    %32 = tpu.matmul %24, %31, %cst_19 {dimension_numbers = #tpu.dot_dimension_numbers<[1], [0], [0], [1], [0, 0, 1, 1], [], []>} : vector<128x128xbf16>, vector<128x128xbf16>, vector<128x128xf32> -> vector<128x128xf32>
    %33 = vector.extract_strided_slice %28 {offsets = [0, 0], sizes = [128, 32], strides = [1, 1]} : vector<128x128xf32> to vector<128x32xf32>
    %34 = arith.truncf %33 : vector<128x32xf32> to vector<128x32xbf16>
    %c0_20 = arith.constant 0 : index
    %c0_21 = arith.constant 0 : index
    %c0_22 = arith.constant 0 : index
    %c0_23 = arith.constant 0 : index
    %35 = vector.load %arg8[%c0_20, %c0_21, %c0_22, %c0_23] : memref<1x4x128x32xbf16, #tpu.memory_space<vmem>>, vector<1x1x128x32xbf16>
    %36 = vector.shape_cast %35 : vector<1x1x128x32xbf16> to vector<128x32xbf16>
    %37 = vector.shape_cast %34 : vector<128x32xbf16> to vector<1x1x128x32xbf16>
    tpu.vector_store %arg8[%c0_20, %c0_21, %c0_22, %c0_23], %37 {strides = array<i32>} : memref<1x4x128x32xbf16, #tpu.memory_space<vmem>>, vector<1x1x128x32xbf16>,
    %38 = vector.extract_strided_slice %30 {offsets = [0, 0], sizes = [128, 32], strides = [1, 1]} : vector<128x128xf32> to vector<128x32xf32>
    %39 = arith.truncf %38 : vector<128x32xf32> to vector<128x32xbf16>
    %c0_24 = arith.constant 0 : index
    %c0_25 = arith.constant 0 : index
    %c0_26 = arith.constant 0 : index
    %c0_27 = arith.constant 0 : index
    %40 = vector.load %arg9[%c0_24, %c0_25, %c0_26, %c0_27] : memref<1x4x128x32xbf16, #tpu.memory_space<vmem>>, vector<1x1x128x32xbf16>
    %41 = vector.shape_cast %40 : vector<1x1x128x32xbf16> to vector<128x32xbf16>
    %42 = vector.shape_cast %39 : vector<128x32xbf16> to vector<1x1x128x32xbf16>
    tpu.vector_store %arg9[%c0_24, %c0_25, %c0_26, %c0_27], %42 {strides = array<i32>} : memref<1x4x128x32xbf16, #tpu.memory_space<vmem>>, vector<1x1x128x32xbf16>,
    %43 = vector.extract_strided_slice %32 {offsets = [0, 0], sizes = [128, 32], strides = [1, 1]} : vector<128x128xf32> to vector<128x32xf32>
    %44 = arith.truncf %43 : vector<128x32xf32> to vector<128x32xbf16>
    %c0_28 = arith.constant 0 : index
    %c0_29 = arith.constant 0 : index
    %c0_30 = arith.constant 0 : index
    %c0_31 = arith.constant 0 : index
    %45 = vector.load %arg10[%c0_28, %c0_29, %c0_30, %c0_31] : memref<1x4x128x32xbf16, #tpu.memory_space<vmem>>, vector<1x1x128x32xbf16>
    %46 = vector.shape_cast %45 : vector<1x1x128x32xbf16> to vector<128x32xbf16>
    %47 = vector.shape_cast %44 : vector<128x32xbf16> to vector<1x1x128x32xbf16>
    tpu.vector_store %arg10[%c0_28, %c0_29, %c0_30, %c0_31], %47 {strides = array<i32>} : memref<1x4x128x32xbf16, #tpu.memory_space<vmem>>, vector<1x1x128x32xbf16>,
    %48 = vector.extract_strided_slice %28 {offsets = [0, 32], sizes = [128, 32], strides = [1, 1]} : vector<128x128xf32> to vector<128x32xf32>
    %49 = arith.truncf %48 : vector<128x32xf32> to vector<128x32xbf16>
    %c0_32 = arith.constant 0 : index
    %c1 = arith.constant 1 : index
    %c0_33 = arith.constant 0 : index
    %c0_34 = arith.constant 0 : index
    %50 = vector.load %arg8[%c0_32, %c1, %c0_33, %c0_34] : memref<1x4x128x32xbf16, #tpu.memory_space<vmem>>, vector<1x1x128x32xbf16>
    %51 = vector.shape_cast %50 : vector<1x1x128x32xbf16> to vector<128x32xbf16>
    %52 = vector.shape_cast %49 : vector<128x32xbf16> to vector<1x1x128x32xbf16>
    tpu.vector_store %arg8[%c0_32, %c1, %c0_33, %c0_34], %52 {strides = array<i32>} : memref<1x4x128x32xbf16, #tpu.memory_space<vmem>>, vector<1x1x128x32xbf16>,
    %53 = vector.extract_strided_slice %30 {offsets = [0, 32], sizes = [128, 32], strides = [1, 1]} : vector<128x128xf32> to vector<128x32xf32>
    %54 = arith.truncf %53 : vector<128x32xf32> to vector<128x32xbf16>
    %c0_35 = arith.constant 0 : index
    %c1_36 = arith.constant 1 : index
    %c0_37 = arith.constant 0 : index
    %c0_38 = arith.constant 0 : index
    %55 = vector.load %arg9[%c0_35, %c1_36, %c0_37, %c0_38] : memref<1x4x128x32xbf16, #tpu.memory_space<vmem>>, vector<1x1x128x32xbf16>
    %56 = vector.shape_cast %55 : vector<1x1x128x32xbf16> to vector<128x32xbf16>
    %57 = vector.shape_cast %54 : vector<128x32xbf16> to vector<1x1x128x32xbf16>
    tpu.vector_store %arg9[%c0_35, %c1_36, %c0_37, %c0_38], %57 {strides = array<i32>} : memref<1x4x128x32xbf16, #tpu.memory_space<vmem>>, vector<1x1x128x32xbf16>,
    %58 = vector.extract_strided_slice %32 {offsets = [0, 32], sizes = [128, 32], strides = [1, 1]} : vector<128x128xf32> to vector<128x32xf32>
    %59 = arith.truncf %58 : vector<128x32xf32> to vector<128x32xbf16>
    %c0_39 = arith.constant 0 : index
    %c1_40 = arith.constant 1 : index
    %c0_41 = arith.constant 0 : index
    %c0_42 = arith.constant 0 : index
    %60 = vector.load %arg10[%c0_39, %c1_40, %c0_41, %c0_42] : memref<1x4x128x32xbf16, #tpu.memory_space<vmem>>, vector<1x1x128x32xbf16>
    %61 = vector.shape_cast %60 : vector<1x1x128x32xbf16> to vector<128x32xbf16>
    %62 = vector.shape_cast %59 : vector<128x32xbf16> to vector<1x1x128x32xbf16>
    tpu.vector_store %arg10[%c0_39, %c1_40, %c0_41, %c0_42], %62 {strides = array<i32>} : memref<1x4x128x32xbf16, #tpu.memory_space<vmem>>, vector<1x1x128x32xbf16>,
    %63 = vector.extract_strided_slice %28 {offsets = [0, 64], sizes = [128, 32], strides = [1, 1]} : vector<128x128xf32> to vector<128x32xf32>
    %64 = arith.truncf %63 : vector<128x32xf32> to vector<128x32xbf16>
    %c0_43 = arith.constant 0 : index
    %c2 = arith.constant 2 : index
    %c0_44 = arith.constant 0 : index
    %c0_45 = arith.constant 0 : index
    %65 = vector.load %arg8[%c0_43, %c2, %c0_44, %c0_45] : memref<1x4x128x32xbf16, #tpu.memory_space<vmem>>, vector<1x1x128x32xbf16>
    %66 = vector.shape_cast %65 : vector<1x1x128x32xbf16> to vector<128x32xbf16>
    %67 = vector.shape_cast %64 : vector<128x32xbf16> to vector<1x1x128x32xbf16>
    tpu.vector_store %arg8[%c0_43, %c2, %c0_44, %c0_45], %67 {strides = array<i32>} : memref<1x4x128x32xbf16, #tpu.memory_space<vmem>>, vector<1x1x128x32xbf16>,
    %68 = vector.extract_strided_slice %30 {offsets = [0, 64], sizes = [128, 32], strides = [1, 1]} : vector<128x128xf32> to vector<128x32xf32>
    %69 = arith.truncf %68 : vector<128x32xf32> to vector<128x32xbf16>
    %c0_46 = arith.constant 0 : index
    %c2_47 = arith.constant 2 : index
    %c0_48 = arith.constant 0 : index
    %c0_49 = arith.constant 0 : index
    %70 = vector.load %arg9[%c0_46, %c2_47, %c0_48, %c0_49] : memref<1x4x128x32xbf16, #tpu.memory_space<vmem>>, vector<1x1x128x32xbf16>
    %71 = vector.shape_cast %70 : vector<1x1x128x32xbf16> to vector<128x32xbf16>
    %72 = vector.shape_cast %69 : vector<128x32xbf16> to vector<1x1x128x32xbf16>
    tpu.vector_store %arg9[%c0_46, %c2_47, %c0_48, %c0_49], %72 {strides = array<i32>} : memref<1x4x128x32xbf16, #tpu.memory_space<vmem>>, vector<1x1x128x32xbf16>,
    %73 = vector.extract_strided_slice %32 {offsets = [0, 64], sizes = [128, 32], strides = [1, 1]} : vector<128x128xf32> to vector<128x32xf32>
    %74 = arith.truncf %73 : vector<128x32xf32> to vector<128x32xbf16>
    %c0_50 = arith.constant 0 : index
    %c2_51 = arith.constant 2 : index
    %c0_52 = arith.constant 0 : index
    %c0_53 = arith.constant 0 : index
    %75 = vector.load %arg10[%c0_50, %c2_51, %c0_52, %c0_53] : memref<1x4x128x32xbf16, #tpu.memory_space<vmem>>, vector<1x1x128x32xbf16>
    %76 = vector.shape_cast %75 : vector<1x1x128x32xbf16> to vector<128x32xbf16>
    %77 = vector.shape_cast %74 : vector<128x32xbf16> to vector<1x1x128x32xbf16>
    tpu.vector_store %arg10[%c0_50, %c2_51, %c0_52, %c0_53], %77 {strides = array<i32>} : memref<1x4x128x32xbf16, #tpu.memory_space<vmem>>, vector<1x1x128x32xbf16>,
    %78 = vector.extract_strided_slice %28 {offsets = [0, 96], sizes = [128, 32], strides = [1, 1]} : vector<128x128xf32> to vector<128x32xf32>
    %79 = arith.truncf %78 : vector<128x32xf32> to vector<128x32xbf16>
    %c0_54 = arith.constant 0 : index
    %c3 = arith.constant 3 : index
    %c0_55 = arith.constant 0 : index
    %c0_56 = arith.constant 0 : index
    %80 = vector.load %arg8[%c0_54, %c3, %c0_55, %c0_56] : memref<1x4x128x32xbf16, #tpu.memory_space<vmem>>, vector<1x1x128x32xbf16>
    %81 = vector.shape_cast %80 : vector<1x1x128x32xbf16> to vector<128x32xbf16>
    %82 = vector.shape_cast %79 : vector<128x32xbf16> to vector<1x1x128x32xbf16>
    tpu.vector_store %arg8[%c0_54, %c3, %c0_55, %c0_56], %82 {strides = array<i32>} : memref<1x4x128x32xbf16, #tpu.memory_space<vmem>>, vector<1x1x128x32xbf16>,
    %83 = vector.extract_strided_slice %30 {offsets = [0, 96], sizes = [128, 32], strides = [1, 1]} : vector<128x128xf32> to vector<128x32xf32>
    %84 = arith.truncf %83 : vector<128x32xf32> to vector<128x32xbf16>
    %c0_57 = arith.constant 0 : index
    %c3_58 = arith.constant 3 : index
    %c0_59 = arith.constant 0 : index
    %c0_60 = arith.constant 0 : index
    %85 = vector.load %arg9[%c0_57, %c3_58, %c0_59, %c0_60] : memref<1x4x128x32xbf16, #tpu.memory_space<vmem>>, vector<1x1x128x32xbf16>
    %86 = vector.shape_cast %85 : vector<1x1x128x32xbf16> to vector<128x32xbf16>
    %87 = vector.shape_cast %84 : vector<128x32xbf16> to vector<1x1x128x32xbf16>
    tpu.vector_store %arg9[%c0_57, %c3_58, %c0_59, %c0_60], %87 {strides = array<i32>} : memref<1x4x128x32xbf16, #tpu.memory_space<vmem>>, vector<1x1x128x32xbf16>,
    %88 = vector.extract_strided_slice %32 {offsets = [0, 96], sizes = [128, 32], strides = [1, 1]} : vector<128x128xf32> to vector<128x32xf32>
    %89 = arith.truncf %88 : vector<128x32xf32> to vector<128x32xbf16>
    %c0_61 = arith.constant 0 : index
    %c3_62 = arith.constant 3 : index
    %c0_63 = arith.constant 0 : index
    %c0_64 = arith.constant 0 : index
    %90 = vector.load %arg10[%c0_61, %c3_62, %c0_63, %c0_64] : memref<1x4x128x32xbf16, #tpu.memory_space<vmem>>, vector<1x1x128x32xbf16>
    %91 = vector.shape_cast %90 : vector<1x1x128x32xbf16> to vector<128x32xbf16>
    %92 = vector.shape_cast %89 : vector<128x32xbf16> to vector<1x1x128x32xbf16>
    tpu.vector_store %arg10[%c0_61, %c3_62, %c0_63, %c0_64], %92 {strides = array<i32>} : memref<1x4x128x32xbf16, #tpu.memory_space<vmem>>, vector<1x1x128x32xbf16>,
    return
  }
  func.func @transform_0(%arg0: i32, %arg1: i32) -> (i32, i32, i32) {
    %c0_i32 = arith.constant 0 : i32
    %c0_i32_0 = arith.constant 0 : i32
    return %arg0, %arg1, %c0_i32 : i32, i32, i32
  }
  func.func @transform_1(%arg0: i32, %arg1: i32) -> (i32, i32) {
    %c0_i32 = arith.constant 0 : i32
    %c0_i32_0 = arith.constant 0 : i32
    %c0_i32_1 = arith.constant 0 : i32
    return %c0_i32, %c0_i32_0 : i32, i32
  }
  func.func @transform_2(%arg0: i32, %arg1: i32) -> (i32, i32) {
    %c0_i32 = arith.constant 0 : i32
    %c0_i32_0 = arith.constant 0 : i32
    %c0_i32_1 = arith.constant 0 : i32
    return %c0_i32, %c0_i32_0 : i32, i32
  }
  func.func @transform_3(%arg0: i32, %arg1: i32) -> (i32, i32) {
    %c0_i32 = arith.constant 0 : i32
    %c0_i32_0 = arith.constant 0 : i32
    %c0_i32_1 = arith.constant 0 : i32
    return %c0_i32, %c0_i32_0 : i32, i32
  }
  func.func @transform_4(%arg0: i32, %arg1: i32) -> (i32, i32) {
    %c0_i32 = arith.constant 0 : i32
    %c0_i32_0 = arith.constant 0 : i32
    %c0_i32_1 = arith.constant 0 : i32
    return %c0_i32, %c0_i32_0 : i32, i32
  }
  func.func @transform_5(%arg0: i32, %arg1: i32) -> (i32, i32) {
    %c0_i32 = arith.constant 0 : i32
    %c0_i32_0 = arith.constant 0 : i32
    %c0_i32_1 = arith.constant 0 : i32
    return %c0_i32, %c0_i32_0 : i32, i32
  }
  func.func @transform_6(%arg0: i32, %arg1: i32) -> (i32, i32, i32, i32) {
    %c0_i32 = arith.constant 0 : i32
    %c0_i32_0 = arith.constant 0 : i32
    %c0_i32_1 = arith.constant 0 : i32
    return %arg0, %c0_i32, %arg1, %c0_i32_0 : i32, i32, i32, i32
  }
  func.func @transform_7(%arg0: i32, %arg1: i32) -> (i32, i32, i32, i32) {
    %c0_i32 = arith.constant 0 : i32
    %c0_i32_0 = arith.constant 0 : i32
    %c0_i32_1 = arith.constant 0 : i32
    return %arg0, %c0_i32, %arg1, %c0_i32_0 : i32, i32, i32, i32
  }
  func.func @transform_8(%arg0: i32, %arg1: i32) -> (i32, i32, i32, i32) {
    %c0_i32 = arith.constant 0 : i32
    %c0_i32_0 = arith.constant 0 : i32
    %c0_i32_1 = arith.constant 0 : i32
    return %arg0, %c0_i32, %arg1, %c0_i32_0 : i32, i32, i32, i32
  }
}

</mosaic_0001>

<bundles_post_ra>
// kernel: tpu_custom_call.1
= control target key start
LH: loop header
LB: loop body
LE: loop exit
PB: predicated region body
PF: predicated region fallthrough
CT: control target
= control target key end

     0   :  { %s5340_s0 = inlined_call_operand.hbm [shape: f32[2,256,128], index: 0, kind: input, shape index: {}]   ;;  %s5341_s1 = inlined_call_operand.vmem [shape: f32[1,128], index: 1, kind: input, shape index: {}]   ;;  %s5342_s2 = inlined_call_operand.vmem [shape: f32[1,128], index: 2, kind: input, shape index: {}]   ;;  %s5343_s3 = inlined_call_operand.hbm [shape: bf16[128,128], index: 3, kind: input, shape index: {}]   ;;  %s5344_s4 = inlined_call_operand.hbm [shape: bf16[128,128], index: 4, kind: input, shape index: {}]   ;;  %s5345_s5 = inlined_call_operand.hbm [shape: bf16[128,128], index: 5, kind: input, shape index: {}]   ;;  %s5346_s6 = inlined_call_operand.vmem [shape: bf16[2,4,256,32], index: 6, kind: output, shape index: {0}]   ;;  %s5347_s7 = inlined_call_operand.vmem [shape: bf16[2,4,256,32], index: 7, kind: output, shape index: {1}]   ;;  %s5348_s8 = inlined_call_operand.vmem [shape: bf16[2,4,256,32], index: 8, kind: output, shape index: {2}]  }
   0x1   :  { %5353 = sst [smem:[#allocation18_spill]] %s5343_s3 }
   0x2   :  { %5354 = sst [smem:[#allocation19_spill]] %s5344_s4 }
   0x3   :  { %5355 = sst [smem:[#allocation20_spill]] %s5345_s5 }
   0x4   :  { %5356 = sst [smem:[#allocation21_spill]] %s5346_s6 }
   0x5   :  { %5357 = sst [smem:[#allocation22_spill]] %s5347_s7 }
   0x6   :  { %5358 = sst [smem:[#allocation23_spill]] %s5348_s8 }
   0x7   :  { %14 = vsyncpa [#allocation3], 0 }
   0x8   :  { %16 = vsyncpa [#allocation3 + $0x1], 0 }
   0x9   :  { %17 = vsyncpa [#allocation5], 0 }
   0xa   :  { %18 = vsyncpa [#allocation8], 0  ;;  %s3923_s27 = smov 0   ;;  %s3925_s28 = smov 0  }
   0xb   :  { %s3927_s29 = smov 0   ;;  %s3929_s30 = smov 0  }
   0xc   :  { %s3931_s9 = smov 0   ;;  %s3933_s10 = smov 0  }
   0xd   :  { %s3935_s11 = smov 0   ;;  %s3937_s12 = smov 0  }
   0xe LB: > { %5359 = sst [smem:[#allocation15_spill]] %s3849_s30  ;;  %s3061_s13 = sadd.s32 4294967295, %s3865_s12   ;;  %s3865_s12 = sphi %s3937_s12, %s24_s12   ;;  %s3861_s11 = sphi %s3935_s11, %s5391_s11   ;;  %s3857_s10 = sphi %s3933_s10, %s5390_s10   ;;  %s3853_s9 = sphi %s3931_s9, %s5389_s9   ;;  %s3849_s30 = sphi %s3929_s30, %s5388_s30   ;;  %s3845_s29 = sphi %s3927_s29, %s5387_s29   ;;  %s3841_s28 = sphi %s3925_s28, %s5386_s28   ;;  %s3837_s27 = sphi %s3923_s27, %s5385_s27  }
   0xf   : > { %5360 = sst [smem:[#allocation16_spill]] %s3853_s9  ;;  %p58_p0 = scmp.ne.s32.totalorder %s3841_s28, %s3837_s27 }
  0x10   : > { %p3963_p1 = scmp.eq.s32.totalorder %s3061_s13, 0  ;;  %p3967_p2 = scmp.eq.s32.totalorder %s3061_s13, 3 }
  0x11   : > { %p3063_p3 = scmp.ge.s32.totalorder %s3865_s12, 1  ;;  %p258_p4 = scmp.lt.s32.totalorder %s3865_s12, 5 }
  0x12   : > { %s5361_s14 = scalar_select %p3963_p1, 1, 0 }
  0x13   : > { %p3975_p5 = por %p3963_p1, %p58_p0  ;;  %p3979_p6 = pnand %p3063_p3, %p258_p4 }
  0x14   : > { %s3867_s18 = smov [#allocation4]   ;;  %s3868_s21 = smov [#allocation6]  }
  0x15   : > { %s5363_s16 = scalar_select %p3975_p5, 1, 0 }
  0x16   : > { %s276_s19 = sshll.u32 %s3867_s18, 4  ;;  %p3534_p7 = pneg %p3979_p6  ;;  %s277_s19 = int_to_ptr.vmem [resolvable:$true] %s276_s19 }
  0x17   : > { %s289_s22 = sshll.u32 %s3868_s21, 4  ;;  %s3696_s23 = scalar_lea.vmem %s277_s19, 1024  ;;  %s290_s22 = int_to_ptr.vmem [resolvable:$true] %s289_s22 }
  0x18   : > { %p3987_p8 = pnand %p3534_p7, %p3963_p1  ;;  %p3697_p10 = scmp.ne.s32.totalorder %s277_s19, %s3696_s23 }
  0x19   : > { %p3704_p13 = scmp.lt.s32.totalorder %s277_s19, %s277_s19  ;;  %p3705_p0 = scmp.lt.s32.totalorder %s3696_s23, %s3696_s23 }
  0x1a   : > { %p3687_p9 = pneg %p3987_p8 }
  0x1b   : > { %p3706_p3 = por %p3705_p0, %p3704_p13 }
  0x1c   : > { %p3699_p11 = pnand %p3697_p10, %p3687_p9 }
  0x1e   : > { %p3700_p12 = pneg %p3699_p11 }
  0x20   : > { %p3707_p4 = pnand %p3706_p3, %p3700_p12 }
  0x22   : > { %3710 = shalt.err (!%p3707_p4)
}
  0x23   : > { %s3869_s24 = smov 64   ;;  %s3870_s25 = smov 4  }
  0x24   : > { %s5366_s3 = sld [smem:[#allocation18_spill]]  ;;  %s3722_s13 = scalar_lea.vmem %s290_s22, 1024 }
  0x25   : > { %p3723_p7 = scmp.ne.s32.totalorder %s290_s22, %s3722_s13  ;;  %p3730_p1 = scmp.lt.s32.totalorder %s290_s22, %s290_s22 }
  0x26   : > { %p3731_p5 = scmp.lt.s32.totalorder %s3722_s13, %s3722_s13 }
  0x27   : > { %p3725_p10 = pnand %p3723_p7, %p3687_p9 }
  0x28   : > { %p3732_p13 = por %p3731_p5, %p3730_p1 }
  0x29   : > { %p3726_p11 = pneg %p3725_p10 }
  0x2a   : > { %3537 = dma.hbm_to_vmem [thread:$0]  (!%p3987_p8), %s5366_s3, 1024, %s277_s19, [#allocation5], %s3869_s24, %s3869_s24, %s3870_s25  }
  0x2b   : > { %p3733_p12 = pnand %p3732_p13, %p3726_p11 }
  0x2d   : > { %3736 = shalt.err (!%p3733_p12)
}
  0x2e   : > { %s5367_s4 = sld [smem:[#allocation19_spill]]  ;;  %s3871_s23 = smov [#allocation7]  }
  0x2f   : > { %s302_s19 = sshll.u32 %s3871_s23, 4  ;;  %s303_s19 = int_to_ptr.vmem [resolvable:$true] %s302_s19 }
  0x30   : > { %s3748_s26 = scalar_lea.vmem %s303_s19, 1024  ;;  %p3756_p7 = scmp.lt.s32.totalorder %s303_s19, %s303_s19 }
  0x31   : > { %p3749_p0 = scmp.ne.s32.totalorder %s303_s19, %s3748_s26  ;;  %p3757_p1 = scmp.lt.s32.totalorder %s3748_s26, %s3748_s26 }
  0x33   : > { %p3751_p3 = pnand %p3749_p0, %p3687_p9  ;;  %p3758_p5 = por %p3757_p1, %p3756_p7 }
  0x34   : > { %3540 = dma.hbm_to_vmem [thread:$0]  (!%p3987_p8), %s5367_s4, 1024, %s290_s22, [#allocation5], %s3869_s24, %s3869_s24, %s3870_s25  }
  0x35   : > { %p3752_p4 = pneg %p3751_p3 }
  0x37   : > { %p3759_p10 = pnand %p3758_p5, %p3752_p4 }
  0x39   : > { %3762 = shalt.err (!%p3759_p10)
}
  0x3a   : > { %s5368_s5 = sld [smem:[#allocation20_spill]]  ;;  %s33_s22 = sadd.s32 1, %s3857_s10 }
  0x3b   : > { %s36_s18 = sadd.s32 1, %s3861_s11  ;;  %p34_p9 = scmp.ge.s32.totalorder %s33_s22, 2 }
  0x3c   : > { %s45_s20 = sadd.s32 1, %s3845_s29  ;;  %p52_p11 = scmp.ne.s32.totalorder %s3845_s29, %s3841_s28 }
  0x3d   : > { %p53_p13 = scmp.eq.s32.totalorder %s3865_s12, 0  ;;  %s5393_s22 = smov (%p34_p9, %s33_s22), 0 }
  0x3e   : > { %5369 = sst [smem:[#allocation17_spill]] %s5393_s22  ;;  %s5395_s18 = smov (!%p34_p9, %s36_s18), %s3861_s11 }
  0x3f   : > { %s41_s21 = ssub.s32 %s3857_s10, %s5393_s22  ;;  %p4028_p12 = por %p53_p13, %p52_p11 }
  0x40   : > { %3543 = dma.hbm_to_vmem [thread:$0]  (!%p3987_p8), %s5368_s5, 1024, %s303_s19, [#allocation8], %s3869_s24, %s3869_s24, %s3870_s25  }
  0x41   : > { %p38_p8 = scmp.ge.s32.totalorder %s5395_s18, 2  ;;  %p4034_p0 = por %p3967_p2, %p52_p11 }
  0x42   : > { %p3551_p3 = scmp.lt.s32.totalorder %s3865_s12, 4  ;;  %s316_s25 = sand.u32 1, %s3845_s29  }
  0x43   : > { %s5397_s18 = smov (%p38_p8, %s5395_s18), 0  ;;  %s3068_s19 = sshll.u32 %s316_s25, 7 }
  0x44   : > { %s40_s26 = ssub.s32 %s3861_s11, %s5397_s18  ;;  %s3069_s13 = sshll.u32 %s3857_s10, 4 }
  0x45   : > { %s42_s27 = sor.u32 %s41_s21, %s40_s26  ;;  %s3070_s3 = sshll.u32 %s3861_s11, 5 }
  0x46   : > { %p43_p4 = scmp.eq.s32.totalorder %s42_s27, 0  ;;  %s326_s4 = sadd.s32 %s3070_s3, %s3069_s13 }
  0x47   : > { %s320_s5 = scalar_lea.vmem [#allocation2], %s3068_s19  ;;  %s3071_s8 = sshll.u32 %s326_s4, 7 }
  0x48   : > { %s329_s15 = sshll.u32 %s320_s5, 4  ;;  %s328_s9 = scalar_lea.hbm %s5340_s0, %s3071_s8  ;;  %s330_s15 = int_to_ptr.vmem [resolvable:$true] %s329_s15 }
  0x49   : > { %s4047_s22 = scalar_select %p43_p4, %s3845_s29, %s45_s20  }
  0x4a   : > { %p4056_p2 = pnand %p3551_p3, %p4028_p12  ;;  %s317_s21 = scalar_lea.sflag [#allocation3], %s316_s25 }
  0x4b   : > { %s3776_s3 = scalar_lea.vmem %s330_s15, 2048  ;;  %s3872_s4 = smov [#allocation2]  }
  0x4c   : > { %p3765_p7 = pneg %p4056_p2  ;;  %p3777_p1 = scmp.ne.s32.totalorder %s330_s15, %s3776_s3 }
  0x4d   : > { %s3781_s5 = sshll.u32 %s3872_s4, 4  ;;  %s3782_s5 = int_to_ptr.vmem [resolvable:$false] %s3781_s5 }
  0x4e   : > { %p3779_p5 = pnand %p3777_p1, %p3765_p7  ;;  %s3783_s20 = scalar_lea.vmem %s3782_s5, 4096 }
  0x4f   : > { %p3784_p9 = scmp.lt.s32.totalorder %s330_s15, %s3782_s5  ;;  %p3785_p11 = scmp.lt.s32.totalorder %s3783_s20, %s3776_s3 }
  0x50   : > { %p3780_p10 = pneg %p3779_p5 }
  0x51   : > { %p3786_p13 = por %p3785_p11, %p3784_p9 }
  0x53   : > { %p3787_p8 = pnand %p3786_p13, %p3780_p10 }
  0x55   : > { %3790 = shalt.err (!%p3787_p8)
}
  0x56   : > { %s3873_s6 = smov 128   ;;  %s3874_s7 = smov 8  }
  0x57   : > { %3547 = dma.hbm_to_vmem [thread:$0]  (!%p4056_p2), %s328_s9, 2048, %s330_s15, %s317_s21, %s3873_s6, %s3873_s6, %s3874_s7  }
  0x58   : > { %341 = sbr.rel (%p3979_p6) target bundleno = 1072 (0x430), region = 44  ;;  %s4067_s8 = sand.u32 (!%p3979_p6), 1, %s3841_s28  }
  0x59   : > { %s3073_s23 = sshll.u32 (!%p3979_p6), %s4067_s8, 7  ;;  %s344_s25 = scalar_lea.sflag (!%p3979_p6), [#allocation3], %s4067_s8 }
  0x5a   : > { %s4071_s19 = scalar_lea.vmem (!%p3979_p6), [#allocation2], %s3073_s23  ;;  %p5373_p12 = scmp.ne.s32.totalorder (!%p3979_p6), %s5363_s16, 0 }
  0x5d   : > { %3824 = dma.done.wait (%p5373_p12), %s344_s25, 2048  }
  0x5e   : > { %3826 = vsyncadd (%p5373_p12), %s344_s25, 4294965248  ;;  %p5374_p3 = scmp.ne.s32.totalorder %s5361_s14, 0 }
  0x60   : > { %3828 = dma.done.wait (%p5374_p3), [#allocation5], 2048  }
  0x61   : > { %3830 = vsyncadd (%p5374_p3), [#allocation5], 4294965248 }
  0x62   : > { %3832 = dma.done.wait (%p5374_p3), [#allocation8], 1024  }
  0x63   : > { %3834 = vsyncadd (%p5374_p3), [#allocation8], 4294966272  ;;  %v404_v0 = vld [vmem:[%s4071_s19] sm:$0xff]  ;;  %v406_v1 = vld [vmem:[%s4071_s19 + $0x10] sm:$0xff]  ;;  %s4282_s17 = sshll.u32 %s4067_s8, 8  ;;  %vm1214_vm0 = vcmask 257024  }
  0x64   : > { %422 = vadd.xlane.f32.xlu0 %v404_v0  ;;  %426 = vadd.xlane.f32.xlu1 %v406_v1  ;;  %v405_v2 = vld [vmem:[%s4071_s19 + $0x8] sm:$0xff]  ;;  %v407_v3 = vld [vmem:[%s4071_s19 + $0x18] sm:$0xff]  ;;  %v408_v4 = vld [vmem:[%s4071_s19 + $0x20] sm:$0xff]  ;;  %s4287_s26 = scalar_lea.vmem [#allocation10], %s4282_s17  ;;  %s3875_s27 = smov 96  }
  0x65   : > { %v409_v5 = vld [vmem:[%s4071_s19 + $0x28] sm:$0xff]  ;;  %v410_v6 = vld [vmem:[%s4071_s19 + $0x30] sm:$0xff]  ;;  %v411_v7 = vld [vmem:[%s4071_s19 + $0x38] sm:$0xff]  ;;  %s4295_s13 = scalar_lea.vmem [#allocation9], %s4282_s17  ;;  %s3876_s15 = smov 64  }
  0x66   : > { %v4094_v8 = vld [vmem:[%s4071_s19 + $0x40] sm:$0xff]  ;;  %v4097_v9 = vld [vmem:[%s4071_s19 + $0x48] sm:$0xff]  ;;  %v4100_v10 = vld [vmem:[%s4071_s19 + $0x50] sm:$0xff]  ;;  %s3877_s21 = smov 32   ;;  %s4475_s3 = scalar_lea.vmem [#allocation11], %s4282_s17 }
  0x67   : > { %v4103_v11 = vld [vmem:[%s4071_s19 + $0x58] sm:$0xff]  ;;  %v4110_v12 = vld [vmem:[%s4071_s19 + $0x60] sm:$0xff]  ;;  %v4113_v13 = vld [vmem:[%s4071_s19 + $0x68] sm:$0xff]  ;;  %s5375_s4 = sld [smem:[#allocation15_spill]] (%p4034_p0) }
  0x68   : > { %424 = vadd.xlane.f32.xlu0 %v405_v2  ;;  %428 = vadd.xlane.f32.xlu1 %v407_v3  ;;  %v4118_v14 = vld [vmem:[%s4071_s19 + $0x70] sm:$0xff]  ;;  %v4121_v15 = vld [vmem:[%s4071_s19 + $0x78] sm:$0xff]  ;;  %s5376_s5 = sld [smem:[#allocation16_spill]] (%p4034_p0) }
  0x69   : > { %v3629_v51 = vld [vmem:[#allocation4 + $0x38] sm:$0xff]   ;;  %v3631_v61 = vld [vmem:[#allocation4 + $0x30] sm:$0xff]   ;;  %s5377_s19 = sld [smem:[#allocation21_spill]] (%p4034_p0) }
  0x6a   : > { %v3630_v52 = vld [vmem:[#allocation6 + $0x38] sm:$0xff]   ;;  %3408 = vmatprep.subr.bf16.mxu0 %v3629_v51  ;;  %v3632_v62 = vld [vmem:[#allocation6 + $0x30] sm:$0xff]  }
  0x6b   : > { %3440 = vmatprep.subr.bf16.mxu1 %v3630_v52  ;;  %3409 = vmatpush3.bf16.msra.mxu0 %v3629_v51 }
  0x6c   : > { %430 = vadd.xlane.f32.xlu0 %v408_v4  ;;  %432 = vadd.xlane.f32.xlu1 %v409_v5 }
  0x6d   : > { %3441 = vmatpush3.bf16.msra.mxu1 %v3630_v52  ;;  %3410 = vmatprep.subr.bf16.mxu0 %v3631_v61  ;;  %s3301_s20 = sshll.u32 (%p4034_p0), %s5375_s4, 4 }
  0x6e   : > { %3442 = vmatprep.subr.bf16.mxu1 %v3632_v62  ;;  %s3302_s6 = sshll.u32 (%p4034_p0), %s5376_s5, 7 }
  0x6f   : > { %3411 = vmatpush3.bf16.msra.mxu0 %v3631_v61  ;;  %s1993_s7 = sadd.s32 (%p4034_p0), %s3302_s6, %s3301_s20 }
  0x70   : > { %434 = vadd.xlane.f32.xlu0 %v410_v6  ;;  %436 = vadd.xlane.f32.xlu1 %v411_v7  ;;  %s3303_s8 = sshll.u32 (%p4034_p0), %s1993_s7, 2 }
  0x71   : > { %3443 = vmatpush3.bf16.msra.mxu1 %v3632_v62  ;;  %s5113_s30 = scalar_lea.vmem (%p4034_p0), %s5377_s19, %s3303_s8 }
  0x74   : > { %438 = vadd.xlane.f32.xlu0 %v4094_v8  ;;  %440 = vadd.xlane.f32.xlu1 %v4097_v9 }
  0x78   : > { %442 = vadd.xlane.f32.xlu0 %v4100_v10  ;;  %444 = vadd.xlane.f32.xlu1 %v4103_v11 }
  0x7c   : > { %446 = vadd.xlane.f32.xlu0 %v4110_v12  ;;  %448 = vadd.xlane.f32.xlu1 %v4113_v13 }
  0x80   : > { %450 = vadd.xlane.f32.xlu0 %v4118_v14  ;;  %452 = vadd.xlane.f32.xlu1 %v4121_v15 }
  0xed   : > { %v423_v16 = vpop.xlane.xlu0 %422  ;;  %v427_v17 = vpop.xlane.xlu1 %426 }
  0xee   : > { %v455_v18 = vmul.f32 0.0078125, %v423_v16  ;;  %v457_v19 = vmul.f32 0.0078125, %v427_v17 }
  0xf0   : > { %v4125_v20 = vsub.f32 %v404_v0, %v455_v18  ;;  %v4127_v21 = vsub.f32 %v406_v1, %v457_v19 }
  0xf1   : > { %v425_v22 = vpop.xlane.xlu0 %424  ;;  %v429_v23 = vpop.xlane.xlu1 %428 }
  0xf2   : > { %v456_v24 = vmul.f32 0.0078125, %v425_v22  ;;  %v487_v25 = vmul.f32 %v4125_v20, %v4125_v20  ;;  %v458_v26 = vmul.f32 0.0078125, %v429_v23  ;;  %v489_v27 = vmul.f32 %v4127_v21, %v4127_v21  ;;  %v3635_v23 = vld [vmem:[#allocation4 + $0x20] sm:$0xff]  }
  0xf4   : > { %503 = vadd.xlane.f32.xlu0 %v487_v25  ;;  %v4133_v28 = vsub.f32 %v405_v2, %v456_v24  ;;  %v4135_v29 = vsub.f32 %v407_v3, %v458_v26  ;;  %v3636_v24 = vld [vmem:[#allocation6 + $0x20] sm:$0xff]  }
  0xf5   : > { %v431_v30 = vpop.xlane.xlu0 %430  ;;  %v433_v31 = vpop.xlane.xlu1 %432 }
  0xf6   : > { %v459_v32 = vmul.f32 0.0078125, %v431_v30  ;;  %v488_v33 = vmul.f32 %v4133_v28, %v4133_v28  ;;  %v460_v34 = vmul.f32 0.0078125, %v433_v31  ;;  %v490_v35 = vmul.f32 %v4135_v29, %v4135_v29  ;;  %v3638_v30 = vld [vmem:[#allocation6 + $0x18] sm:$0xff]  }
  0xf8   : > { %507 = vadd.xlane.f32.xlu0 %v489_v27  ;;  %505 = vadd.xlane.f32.xlu1 %v488_v33  ;;  %v4141_v36 = vsub.f32 %v408_v4, %v459_v32  ;;  %v4143_v37 = vsub.f32 %v409_v5, %v460_v34  ;;  %v3637_v27 = vld [vmem:[#allocation4 + $0x18] sm:$0xff]   ;;  %v3641_v32 = vld [vmem:[#allocation4 + $0x8] sm:$0xff]   ;;  %v3643_v34 = vld [vmem:[#allocation4] sm:$0xff]  }
  0xf9   : > { %v435_v38 = vpop.xlane.xlu0 %434  ;;  %v437_v39 = vpop.xlane.xlu1 %436  ;;  %v3642_v33 = vld [vmem:[#allocation6 + $0x8] sm:$0xff]  }
  0xfa   : > { %v461_v40 = vmul.f32 0.0078125, %v435_v38  ;;  %v491_v41 = vmul.f32 %v4141_v36, %v4141_v36  ;;  %v462_v42 = vmul.f32 0.0078125, %v437_v39  ;;  %v492_v43 = vmul.f32 %v4143_v37, %v4143_v37  ;;  %v4197_v38 = vld [vmem:[#allocation7 + $0x38] sm:$0xff]  }
  0xfc   : > { %509 = vadd.xlane.f32.xlu1 %v490_v35  ;;  %511 = vadd.xlane.f32.xlu0 %v491_v41  ;;  %v4149_v44 = vsub.f32 %v410_v6, %v461_v40  ;;  %v4151_v45 = vsub.f32 %v411_v7, %v462_v42  ;;  %v3633_v7 = vld [vmem:[#allocation4 + $0x28] sm:$0xff]   ;;  %v3644_v35 = vld [vmem:[#allocation6] sm:$0xff]  }
  0xfd   : > { %v439_v46 = vpop.xlane.xlu0 %438  ;;  %v441_v47 = vpop.xlane.xlu1 %440  ;;  %3412 = vmatprep.subr.bf16.mxu0 %v3633_v7 }
  0xfe   : > { %v463_v48 = vmul.f32 0.0078125, %v439_v46  ;;  %v493_v49 = vmul.f32 %v4149_v44, %v4149_v44  ;;  %v464_v50 = vmul.f32 0.0078125, %v441_v47  ;;  %v494_v53 = vmul.f32 %v4151_v45, %v4151_v45  ;;  %3413 = vmatpush3.bf16.msra.mxu0 %v3633_v7 }
  0xff   : > { %3414 = vmatprep.subr.bf16.mxu0 %v3635_v23 }
 0x100   : > { %513 = vadd.xlane.f32.xlu1 %v492_v43  ;;  %515 = vadd.xlane.f32.xlu0 %v493_v49  ;;  %v4158_v54 = vsub.f32 %v4094_v8, %v463_v48  ;;  %v4161_v55 = vsub.f32 %v4097_v9, %v464_v50  ;;  %v3634_v8 = vld [vmem:[#allocation6 + $0x28] sm:$0xff]  }
 0x101   : > { %v443_v56 = vpop.xlane.xlu0 %442  ;;  %v445_v57 = vpop.xlane.xlu1 %444  ;;  %3444 = vmatprep.subr.bf16.mxu1 %v3634_v8 }
 0x102   : > { %v465_v58 = vmul.f32 0.0078125, %v443_v56  ;;  %v495_v59 = vmul.f32 %v4158_v54, %v4158_v54  ;;  %v466_v60 = vmul.f32 0.0078125, %v445_v57  ;;  %v496_v63 = vmul.f32 %v4161_v55, %v4161_v55  ;;  %3445 = vmatpush3.bf16.msra.mxu1 %v3634_v8  ;;  %3415 = vmatpush3.bf16.msra.mxu0 %v3635_v23 }
 0x103   : > { %3446 = vmatprep.subr.bf16.mxu1 %v3636_v24  ;;  %3416 = vmatprep.subr.bf16.mxu0 %v3637_v27 }
 0x104   : > { %517 = vadd.xlane.f32.xlu1 %v494_v53  ;;  %519 = vadd.xlane.f32.xlu0 %v495_v59  ;;  %v4168_v0 = vsub.f32 %v4100_v10, %v465_v58  ;;  %v4171_v1 = vsub.f32 %v4103_v11, %v466_v60 }
 0x105   : > { %v447_v2 = vpop.xlane.xlu0 %446  ;;  %v449_v3 = vpop.xlane.xlu1 %448 }
 0x106   : > { %v467_v4 = vmul.f32 0.0078125, %v447_v2  ;;  %v497_v5 = vmul.f32 %v4168_v0, %v4168_v0  ;;  %v468_v6 = vmul.f32 0.0078125, %v449_v3  ;;  %v498_v9 = vmul.f32 %v4171_v1, %v4171_v1  ;;  %3447 = vmatpush3.bf16.msra.mxu1 %v3636_v24  ;;  %3417 = vmatpush3.bf16.msra.mxu0 %v3637_v27 }
 0x107   : > { %3448 = vmatprep.subr.bf16.mxu1 %v3638_v30 }
 0x108   : > { %521 = vadd.xlane.f32.xlu1 %v496_v63  ;;  %523 = vadd.xlane.f32.xlu0 %v497_v5  ;;  %v4178_v10 = vsub.f32 %v4110_v12, %v467_v4  ;;  %v4181_v11 = vsub.f32 %v4113_v13, %v468_v6 }
 0x109   : > { %v451_v16 = vpop.xlane.xlu0 %450  ;;  %v453_v17 = vpop.xlane.xlu1 %452 }
 0x10a   : > { %v469_v18 = vmul.f32 0.0078125, %v451_v16  ;;  %v499_v19 = vmul.f32 %v4178_v10, %v4178_v10  ;;  %v470_v22 = vmul.f32 0.0078125, %v453_v17  ;;  %v500_v12 = vmul.f32 %v4181_v11, %v4181_v11  ;;  %3449 = vmatpush3.bf16.msra.mxu1 %v3638_v30  ;;  %v4211_v30 = vld [vmem:[%s5342_s2] ss:$0 sm:$0xff] }
 0x10c   : > { %525 = vadd.xlane.f32.xlu1 %v498_v9  ;;  %527 = vadd.xlane.f32.xlu0 %v499_v19  ;;  %v4188_v13 = vsub.f32 %v4118_v14, %v469_v18  ;;  %v4191_v25 = vsub.f32 %v4121_v15, %v470_v22  ;;  %v3639_v14 = vld [vmem:[#allocation4 + $0x10] sm:$0xff]   ;;  %v4204_v9 = vld [vmem:[%s5341_s1] ss:$0 sm:$0xff] }
 0x10d   : > { %v3640_v15 = vld [vmem:[#allocation6 + $0x10] sm:$0xff]   ;;  %3418 = vmatprep.subr.bf16.mxu0 %v3639_v14 }
 0x10e   : > { %v501_v26 = vmul.f32 %v4188_v13, %v4188_v13  ;;  %v502_v31 = vmul.f32 %v4191_v25, %v4191_v25  ;;  %3450 = vmatprep.subr.bf16.mxu1 %v3640_v15  ;;  %3419 = vmatpush3.bf16.msra.mxu0 %v3639_v14 }
 0x10f   : > { %3451 = vmatpush3.bf16.msra.mxu1 %v3640_v15  ;;  %3420 = vmatprep.subr.bf16.mxu0 %v3641_v32 }
 0x110   : > { %529 = vadd.xlane.f32.xlu1 %v500_v12  ;;  %531 = vadd.xlane.f32.xlu0 %v501_v26 }
 0x111   : > { %3452 = vmatprep.subr.bf16.mxu1 %v3642_v33 }
 0x112   : > { %3421 = vmatpush3.bf16.msra.mxu0 %v3641_v32 }
 0x113   : > { %3453 = vmatpush3.bf16.msra.mxu1 %v3642_v33  ;;  %3422 = vmatprep.subr.bf16.mxu0 %v3643_v34 }
 0x114   : > { %533 = vadd.xlane.f32.xlu1 %v502_v31  ;;  %3454 = vmatprep.subr.bf16.mxu1 %v3644_v35 }
 0x116   : > { %3423 = vmatpush3.bf16.msra.mxu0 %v3643_v34 }
 0x117   : > { %3455 = vmatpush3.bf16.msra.mxu1 %v3644_v35  ;;  %3472 = vmatprep.subr.bf16.mxu0 %v4197_v38 }
 0x118   : > { %3504 = vmatprep.subr.bf16.mxu1 %v4197_v38 }
 0x17d   : > { %v504_v39 = vpop.xlane.xlu0 %503 }
 0x17e   : > { %v535_v40 = vmul.f32 0.0078125, %v504_v39 }
 0x180   : > { %v551_v41 = vadd.f32 1e-05, %v535_v40 }
 0x181   : > { %v506_v42 = vpop.xlane.xlu1 %505  ;;  %v508_v43 = vpop.xlane.xlu0 %507 }
 0x182   : > { %3653 = vrsqrt.f32 %v551_v41  ;;  %v536_v46 = vmul.f32 0.0078125, %v506_v42  ;;  %v537_v47 = vmul.f32 0.0078125, %v508_v43 }
 0x184   : > { %v552_v48 = vadd.f32 1e-05, %v536_v46  ;;  %v553_v49 = vadd.f32 1e-05, %v537_v47 }
 0x185   : > { %v510_v50 = vpop.xlane.xlu1 %509  ;;  %v512_v51 = vpop.xlane.xlu0 %511 }
 0x186   : > { %3655 = vrsqrt.f32 %v552_v48  ;;  %v538_v52 = vmul.f32 0.0078125, %v510_v50  ;;  %v539_v53 = vmul.f32 0.0078125, %v512_v51 }
 0x187   : > { %3657 = vrsqrt.f32 %v553_v49 }
 0x188   : > { %v554_v56 = vadd.f32 1e-05, %v538_v52  ;;  %v555_v57 = vadd.f32 1e-05, %v539_v53 }
 0x189   : > { %v514_v58 = vpop.xlane.xlu1 %513  ;;  %v516_v59 = vpop.xlane.xlu0 %515 }
 0x18a   : > { %3659 = vrsqrt.f32 %v554_v56  ;;  %v540_v60 = vmul.f32 0.0078125, %v514_v58  ;;  %v541_v61 = vmul.f32 0.0078125, %v516_v59 }
 0x18b   : > { %3661 = vrsqrt.f32 %v555_v57 }
 0x18c   : > { %v556_v62 = vadd.f32 1e-05, %v540_v60  ;;  %v557_v63 = vadd.f32 1e-05, %v541_v61 }
 0x18d   : > { %v518_v2 = vpop.xlane.xlu1 %517  ;;  %v520_v3 = vpop.xlane.xlu0 %519 }
 0x18e   : > { %3663 = vrsqrt.f32 %v556_v62  ;;  %v542_v4 = vmul.f32 0.0078125, %v518_v2  ;;  %v543_v5 = vmul.f32 0.0078125, %v520_v3 }
 0x18f   : > { %v3654_v6 = vpop.eup %3653  ;;  %3665 = vrsqrt.f32 %v557_v63 }
 0x190   : > { %v558_v7 = vadd.f32 1e-05, %v542_v4  ;;  %v559_v8 = vadd.f32 1e-05, %v543_v5  ;;  %v583_v16 = vmul.f32 %v3654_v6, %v4125_v20  ;;  %v3646_v5 = vld [vmem:[#allocation7 + $0x30] sm:$0xff]  }
 0x191   : > { %v522_v17 = vpop.xlane.xlu1 %521  ;;  %v524_v18 = vpop.xlane.xlu0 %523 }
 0x192   : > { %3667 = vrsqrt.f32 %v558_v7  ;;  %v544_v19 = vmul.f32 0.0078125, %v522_v17  ;;  %v545_v22 = vmul.f32 0.0078125, %v524_v18  ;;  %v605_v24 = vmul.f32 %v4204_v9, %v583_v16 }
 0x193   : > { %v3656_v23 = vpop.eup %3655  ;;  %3669 = vrsqrt.f32 %v559_v8 }
 0x194   : > { %v3658_v12 = vpop.eup %3657  ;;  %v560_v26 = vadd.f32 1e-05, %v544_v19  ;;  %v561_v27 = vadd.f32 1e-05, %v545_v22  ;;  %v584_v31 = vmul.f32 %v3656_v23, %v4133_v28  ;;  %v627_v39 = vadd.f32 %v4211_v30, %v605_v24  ;;  %v3647_v23 = vld [vmem:[#allocation7 + $0x28] sm:$0xff]  }
 0x195   : > { %v526_v20 = vpop.xlane.xlu1 %525  ;;  %v528_v14 = vpop.xlane.xlu0 %527  ;;  %v585_v15 = vmul.f32 %v3658_v12, %v4127_v21 }
 0x196   : > { %3671 = vrsqrt.f32 %v560_v26  ;;  %v546_v32 = vmul.f32 0.0078125, %v526_v20  ;;  %v547_v33 = vmul.f32 0.0078125, %v528_v14  ;;  %v606_v34 = vmul.f32 %v4204_v9, %v584_v31  ;;  %v3648_v14 = vld [vmem:[#allocation7 + $0x20] sm:$0xff]  }
 0x197   : > { %v3660_v35 = vpop.eup %3659  ;;  %3673 = vrsqrt.f32 %v561_v27  ;;  %v607_v21 = vmul.f32 %v4204_v9, %v585_v15 }
 0x198   : > { %v3662_v40 = vpop.eup %3661  ;;  %v562_v41 = vadd.f32 1e-05, %v546_v32  ;;  %v563_v42 = vadd.f32 1e-05, %v547_v33  ;;  %v628_v43 = vadd.f32 %v4211_v30, %v606_v34  ;;  %v586_v28 = vmul.f32 %v3660_v35, %v4135_v29 }
 0x199   : > { %v530_v46 = vpop.xlane.xlu1 %529  ;;  %v532_v47 = vpop.xlane.xlu0 %531  ;;  %v587_v48 = vmul.f32 %v3662_v40, %v4141_v36  ;;  %v629_v60 = vadd.f32 %v4211_v30, %v607_v21 }
 0x19a   : > { %3675 = vrsqrt.f32 %v562_v41  ;;  %v548_v49 = vmul.f32 0.0078125, %v530_v46  ;;  %v549_v50 = vmul.f32 0.0078125, %v532_v47  ;;  %v4221_v51 = vpack.c.bf16 %v628_v43, %v627_v39 }
 0x19b   : > { %v3664_v52 = vpop.eup %3663  ;;  %3677 = vrsqrt.f32 %v563_v42  ;;  %v608_v53 = vmul.f32 %v4204_v9, %v586_v28  ;;  %v609_v36 = vmul.f32 %v4204_v9, %v587_v48  ;;  %v3649_v42 = vld [vmem:[#allocation7 + $0x18] sm:$0xff]  }
 0x19c   : > { %v3666_v56 = vpop.eup %3665  ;;  %v564_v57 = vadd.f32 1e-05, %v548_v49  ;;  %v565_v58 = vadd.f32 1e-05, %v549_v50  ;;  %3424 = vmatprep.mubr.bf16.mxu0 %v4221_v51  ;;  %3456 = vmatprep.mubr.bf16.mxu1 %v4221_v51  ;;  %v588_v29 = vmul.f32 %v3664_v52, %v4143_v37  ;;  %v3650_v49 = vld [vmem:[#allocation7 + $0x10] sm:$0xff]  }
 0x19d   : > { %v534_v59 = vpop.xlane.xlu1 %533  ;;  %v630_v61 = vadd.f32 %v4211_v30, %v608_v53  ;;  %v589_v62 = vmul.f32 %v3666_v56, %v4149_v44  ;;  %v631_v8 = vadd.f32 %v4211_v30, %v609_v36  ;;  %v3652_v36 = vld [vmem:[#allocation7] sm:$0xff]  }
 0x19e   : > { %3679 = vrsqrt.f32 %v564_v57  ;;  %v550_v63 = vmul.f32 0.0078125, %v534_v59  ;;  %v610_v2 = vmul.f32 %v4204_v9, %v588_v29  ;;  %v3651_v57 = vld [vmem:[#allocation7 + $0x8] sm:$0xff]  }
 0x19f   : > { %v3668_v3 = vpop.eup %3667  ;;  %3681 = vrsqrt.f32 %v565_v58  ;;  %v4232_v4 = vpack.c.bf16 %v630_v61, %v629_v60  ;;  %v611_v37 = vmul.f32 %v4204_v9, %v589_v62 }
 0x1a0   : > { %v3670_v6 = vpop.eup %3669  ;;  %v566_v7 = vadd.f32 1e-05, %v550_v63  ;;  %v632_v16 = vadd.f32 %v4211_v30, %v610_v2  ;;  %v590_v17 = vmul.f32 %v3668_v3, %v4151_v45 }
 0x1a1   : > { %3425 = vmatmul.mubr.bf16.vlgmr.msra.gmra.mxu0 %v4232_v4  ;;  %3457 = vmatmul.mubr.bf16.vlgmr.msra.gmra.mxu1 %v4232_v4  ;;  %v591_v44 = vmul.f32 %v3670_v6, %v4158_v54  ;;  %v633_v45 = vadd.f32 %v4211_v30, %v611_v37 }
 0x1a2   : > { %3683 = vrsqrt.f32 %v566_v7  ;;  %3473 = vmatpush3.bf16.msra.mxu0 %v4197_v38  ;;  %3512 = vmatpush3.bf16.msra.mxu1 %v4197_v38  ;;  %v4243_v18 = vpack.c.bf16 %v632_v16, %v631_v8  ;;  %v612_v19 = vmul.f32 %v4204_v9, %v590_v17 }
 0x1a3   : > { %v3672_v22 = vpop.eup %3671  ;;  %3474 = vmatprep.subr.bf16.mxu0 %v3646_v5  ;;  %3505 = vmatprep.subr.bf16.mxu1 %v3646_v5  ;;  %v613_v38 = vmul.f32 %v4204_v9, %v591_v44 }
 0x1a4   : > { %v3674_v24 = vpop.eup %3673  ;;  %3428 = vmatprep.mubr.bf16.mxu0 %v4243_v18  ;;  %3460 = vmatprep.mubr.bf16.mxu1 %v4243_v18  ;;  %v634_v54 = vadd.f32 %v4211_v30, %v612_v19  ;;  %v592_v12 = vmul.f32 %v3672_v22, %v4161_v55 }
 0x1a5   : > { %v593_v26 = vmul.f32 %v3674_v24, %v4168_v0  ;;  %v635_v33 = vadd.f32 %v4211_v30, %v613_v38 }
 0x1a6   : > { %3475 = vmatpush3.bf16.msra.mxu0 %v3646_v5  ;;  %3513 = vmatpush3.bf16.msra.mxu1 %v3646_v5  ;;  %v4253_v27 = vpack.c.bf16 %v634_v54, %v633_v45  ;;  %v614_v31 = vmul.f32 %v4204_v9, %v592_v12 }
 0x1a7   : > { %v3676_v20 = vpop.eup %3675  ;;  %3476 = vmatprep.subr.bf16.mxu0 %v3647_v23  ;;  %3506 = vmatprep.subr.bf16.mxu1 %v3647_v23  ;;  %v615_v15 = vmul.f32 %v4204_v9, %v593_v26 }
 0x1a8   : > { %v3678_v32 = vpop.eup %3677  ;;  %v636_v55 = vadd.f32 %v4211_v30, %v614_v31  ;;  %v594_v34 = vmul.f32 %v3676_v20, %v4171_v1 }
 0x1a9   : > { %3429 = vmatmul.mubr.bf16.gmra.mxu0 %v4253_v27  ;;  %3461 = vmatmul.mubr.bf16.gmra.mxu1 %v4253_v27  ;;  %v595_v0 = vmul.f32 %v3678_v32, %v4178_v10  ;;  %v637_v41 = vadd.f32 %v4211_v30, %v615_v15 }
 0x1aa   : > { %3477 = vmatpush3.bf16.msra.mxu0 %v3647_v23  ;;  %3514 = vmatpush3.bf16.msra.mxu1 %v3647_v23  ;;  %v647_v35 = vpack.c.bf16 %v636_v55, %v635_v33  ;;  %v616_v39 = vmul.f32 %v4204_v9, %v594_v34 }
 0x1ab   : > { %v3680_v40 = vpop.eup %3679  ;;  %3478 = vmatprep.subr.bf16.mxu0 %v3648_v14  ;;  %3507 = vmatprep.subr.bf16.mxu1 %v3648_v14  ;;  %v617_v10 = vmul.f32 %v4204_v9, %v595_v0 }
 0x1ac   : > { %v3682_v43 = vpop.eup %3681  ;;  %3432 = vmatprep.mubr.bf16.mxu0 %v647_v35  ;;  %3464 = vmatprep.mubr.bf16.mxu1 %v647_v35  ;;  %v638_v1 = vadd.f32 %v4211_v30, %v616_v39  ;;  %v596_v28 = vmul.f32 %v3680_v40, %v4181_v11 }
 0x1ad   : > { %v597_v46 = vmul.f32 %v3682_v43, %v4188_v13  ;;  %v639_v50 = vadd.f32 %v4211_v30, %v617_v10 }
 0x1ae   : > { %3479 = vmatpush3.bf16.msra.mxu0 %v3648_v14  ;;  %3515 = vmatpush3.bf16.msra.mxu1 %v3648_v14  ;;  %v648_v47 = vpack.c.bf16 %v638_v1, %v637_v41  ;;  %v618_v21 = vmul.f32 %v4204_v9, %v596_v28 }
 0x1af   : > { %v3684_v48 = vpop.eup %3683  ;;  %3480 = vmatprep.subr.bf16.mxu0 %v3649_v42  ;;  %3508 = vmatprep.subr.bf16.mxu1 %v3649_v42  ;;  %v619_v11 = vmul.f32 %v4204_v9, %v597_v46 }
 0x1b0   : > { %v640_v52 = vadd.f32 %v4211_v30, %v618_v21  ;;  %v598_v53 = vmul.f32 %v3684_v48, %v4191_v25 }
 0x1b1   : > { %3433 = vmatmul.mubr.bf16.gmra.mxu0 %v648_v47  ;;  %3465 = vmatmul.mubr.bf16.gmra.mxu1 %v648_v47  ;;  %v641_v58 = vadd.f32 %v4211_v30, %v619_v11 }
 0x1b2   : > { %3481 = vmatpush3.bf16.msra.mxu0 %v3649_v42  ;;  %3516 = vmatpush3.bf16.msra.mxu1 %v3649_v42  ;;  %v649_v13 = vpack.c.bf16 %v640_v52, %v639_v50  ;;  %v620_v56 = vmul.f32 %v4204_v9, %v598_v53 }
 0x1b3   : > { %3482 = vmatprep.subr.bf16.mxu0 %v3650_v49  ;;  %3509 = vmatprep.subr.bf16.mxu1 %v3650_v49 }
 0x1b4   : > { %3436 = vmatprep.mubr.bf16.mxu0 %v649_v13  ;;  %3468 = vmatprep.mubr.bf16.mxu1 %v649_v13  ;;  %v642_v29 = vadd.f32 %v4211_v30, %v620_v56 }
 0x1b6   : > { %3483 = vmatpush3.bf16.msra.mxu0 %v3650_v49  ;;  %3517 = vmatpush3.bf16.msra.mxu1 %v3650_v49  ;;  %v650_v25 = vpack.c.bf16 %v642_v29, %v641_v58 }
 0x1b7   : > { %3484 = vmatprep.subr.bf16.mxu0 %v3651_v57  ;;  %3510 = vmatprep.subr.bf16.mxu1 %v3651_v57 }
 0x1b9   : > { %3437 = vmatmul.mubr.bf16.gmra.mxu0 %v650_v25  ;;  %3469 = vmatmul.mubr.bf16.gmra.mxu1 %v650_v25 }
 0x1ba   : > { %3485 = vmatpush3.bf16.msra.mxu0 %v3651_v57  ;;  %3518 = vmatpush3.bf16.msra.mxu1 %v3651_v57 }
 0x1bb   : > { %3488 = vmatprep.mubr.bf16.mxu0 %v4221_v51  ;;  %3496 = vmatprep.mubr.bf16.mxu1 %v647_v35 }
 0x1bc   : > { %3486 = vmatprep.subr.bf16.mxu0 %v3652_v36  ;;  %3511 = vmatprep.subr.bf16.mxu1 %v3652_v36 }
 0x1be   : > { %3487 = vmatpush3.bf16.msra.mxu0 %v3652_v36  ;;  %3519 = vmatpush3.bf16.msra.mxu1 %v3652_v36 }
 0x1c1   : > { %3489 = vmatmul.mubr.bf16.vlgmr.msra.gmra.mxu0 %v4232_v4  ;;  %3497 = vmatmul.mubr.bf16.vlgmr.msra.gmra.mxu1 %v648_v47 }
 0x1c2   : > { %3492 = vmatprep.mubr.bf16.mxu0 %v4243_v18  ;;  %3500 = vmatprep.mubr.bf16.mxu1 %v649_v13 }
 0x1c9   : > { %3493 = vmatmul.mubr.bf16.gmra.mxu0 %v4253_v27  ;;  %3501 = vmatmul.mubr.bf16.gmra.mxu1 %v650_v25 }
 0x261   : > { %v3426_v9 = vpop.f32.mrf.mxu0  ;;  %v3458_v30 = vpop.f32.mrf.mxu1 }
 0x262   : > { %v814_v51 = vmul.f32 0.17677669, %v3426_v9  ;;  %v3330_v59 = vpack.c.bf16 %v3458_v30, %v3458_v30 }
 0x263   : > { %v749_v60 = vpop.f32.mrf.mxu0  ;;  %v926_v61 = vpop.f32.mrf.mxu1 }
 0x264   : > { %v4284_v62 = vpack.c.bf16 %v814_v51, %v814_v51  ;;  %1297 = vst.msk [vmem:[%s4287_s26 + $0x8] sm:$0xf] %vm1214_vm0, %v3330_v59  ;;  %v812_v63 = vmul.f32 0.17677669, %v749_v60  ;;  %v4291_v2 = vpack.c.bf16 %v926_v61, %v926_v61  ;;  %1460 = vrot.lane.b32.xlu0 %v3330_v59, %s3875_s27 }
 0x265   : > { %v3427_v3 = vpop.f32.mrf.mxu0  ;;  %v3459_v4 = vpop.f32.mrf.mxu1 }
 0x266   : > { %1217 = vst.msk [vmem:[%s4295_s13 + $0x8] sm:$0xf] %vm1214_vm0, %v4284_v62  ;;  %v4300_v5 = vpack.c.bf16 %v812_v63, %v812_v63  ;;  %1295 = vst.msk [vmem:[%s4287_s26] sm:$0xf] %vm1214_vm0, %v4291_v2  ;;  %v815_v37 = vmul.f32 0.17677669, %v3427_v3  ;;  %v3331_v6 = vpack.c.bf16 %v3459_v4, %v3459_v4  ;;  %1395 = vrot.lane.b32.xlu1 %v4284_v62, %s3875_s27 }
 0x267   : > { %v752_v7 = vpop.f32.mrf.mxu0  ;;  %v929_v8 = vpop.f32.mrf.mxu1 }
 0x268   : > { %1215 = vst.msk [vmem:[%s4295_s13] sm:$0xf] %vm1214_vm0, %v4300_v5  ;;  %v4310_v16 = vpack.c.bf16 %v815_v37, %v815_v37  ;;  %1298 = vst.msk [vmem:[%s4287_s26 + $0xc] sm:$0xf] %vm1214_vm0, %v3331_v6  ;;  %v813_v17 = vmul.f32 0.17677669, %v752_v7  ;;  %v4314_v44 = vpack.c.bf16 %v929_v8, %v929_v8  ;;  %1655 = vrot.lane.b32.xlu0 %v3330_v59, %s3876_s15 }
 0x269   : > { %v3430_v18 = vpop.f32.mrf.mxu0  ;;  %v3462_v19 = vpop.f32.mrf.mxu1 }
 0x26a   : > { %1218 = vst.msk [vmem:[%s4295_s13 + $0xc] sm:$0xf] %vm1214_vm0, %v4310_v16  ;;  %v4320_v22 = vpack.c.bf16 %v813_v17, %v813_v17  ;;  %1296 = vst.msk [vmem:[%s4287_s26 + $0x4] sm:$0xf] %vm1214_vm0, %v4314_v44  ;;  %v818_v45 = vmul.f32 0.17677669, %v3430_v18  ;;  %v4325_v23 = vpack.c.bf16 %v3462_v19, %v3462_v19  ;;  %1462 = vrot.lane.b32.xlu1 %v3331_v6, %s3875_s27 }
 0x26b   : > { %v765_v24 = vpop.f32.mrf.mxu0  ;;  %v942_v54 = vpop.f32.mrf.mxu1 }
 0x26c   : > { %1216 = vst.msk [vmem:[%s4295_s13 + $0x4] sm:$0xf] %vm1214_vm0, %v4320_v22  ;;  %v4331_v12 = vpack.c.bf16 %v818_v45, %v818_v45  ;;  %1301 = vst.msk [vmem:[%s4287_s26 + $0x18] sm:$0xf] %vm1214_vm0, %v4325_v23  ;;  %v816_v38 = vmul.f32 0.17677669, %v765_v24  ;;  %v4336_v26 = vpack.c.bf16 %v942_v54, %v942_v54  ;;  %1850 = vrot.lane.b32.xlu0 %v3330_v59, %s3877_s21 }
 0x26d   : > { %v3431_v27 = vpop.f32.mrf.mxu0  ;;  %v3463_v31 = vpop.f32.mrf.mxu1 }
 0x26e   : > { %1221 = vst.msk [vmem:[%s4295_s13 + $0x18] sm:$0xf] %vm1214_vm0, %v4331_v12  ;;  %v4342_v20 = vpack.c.bf16 %v816_v38, %v816_v38  ;;  %1299 = vst.msk [vmem:[%s4287_s26 + $0x10] sm:$0xf] %vm1214_vm0, %v4336_v26  ;;  %v819_v14 = vmul.f32 0.17677669, %v3431_v27  ;;  %v4347_v15 = vpack.c.bf16 %v3463_v31, %v3463_v31  ;;  %1657 = vrot.lane.b32.xlu1 %v3331_v6, %s3876_s15 }
 0x26f   : > { %v768_v32 = vpop.f32.mrf.mxu0  ;;  %v945_v33 = vpop.f32.mrf.mxu1 }
 0x270   : > { %1219 = vst.msk [vmem:[%s4295_s13 + $0x10] sm:$0xf] %vm1214_vm0, %v4342_v20  ;;  %v4353_v55 = vpack.c.bf16 %v819_v14, %v819_v14  ;;  %1302 = vst.msk [vmem:[%s4287_s26 + $0x1c] sm:$0xf] %vm1214_vm0, %v4347_v15  ;;  %v817_v34 = vmul.f32 0.17677669, %v768_v32  ;;  %v4358_v0 = vpack.c.bf16 %v945_v33, %v945_v33  ;;  %1456 = vrot.lane.b32.xlu0 %v4291_v2, %s3875_s27 }
 0x271   : > { %v3434_v35 = vpop.f32.mrf.mxu0  ;;  %v3466_v39 = vpop.f32.mrf.mxu1 }
 0x272   : > { %1222 = vst.msk [vmem:[%s4295_s13 + $0x1c] sm:$0xf] %vm1214_vm0, %v4353_v55  ;;  %v4365_v40 = vpack.c.bf16 %v817_v34, %v817_v34  ;;  %1300 = vst.msk [vmem:[%s4287_s26 + $0x14] sm:$0xf] %vm1214_vm0, %v4358_v0  ;;  %v822_v41 = vmul.f32 0.17677669, %v3434_v35  ;;  %v4370_v42 = vpack.c.bf16 %v3466_v39, %v3466_v39  ;;  %1852 = vrot.lane.b32.xlu1 %v3331_v6, %s3877_s21 }
 0x273   : > { %v781_v43 = vpop.f32.mrf.mxu0  ;;  %v958_v1 = vpop.f32.mrf.mxu1 }
 0x274   : > { %1220 = vst.msk [vmem:[%s4295_s13 + $0x14] sm:$0xf] %vm1214_vm0, %v4365_v40  ;;  %v4376_v28 = vpack.c.bf16 %v822_v41, %v822_v41  ;;  %1305 = vst.msk [vmem:[%s4287_s26 + $0x28] sm:$0xf] %vm1214_vm0, %v4370_v42  ;;  %v820_v10 = vmul.f32 0.17677669, %v781_v43  ;;  %v4381_v46 = vpack.c.bf16 %v958_v1, %v958_v1  ;;  %1590 = vrot.lane.b32.xlu0 %v4284_v62, %s3876_s15 }
 0x275   : > { %v3435_v47 = vpop.f32.mrf.mxu0  ;;  %v3467_v21 = vpop.f32.mrf.mxu1 }
 0x276   : > { %1225 = vst.msk [vmem:[%s4295_s13 + $0x28] sm:$0xf] %vm1214_vm0, %v4376_v28  ;;  %v4388_v48 = vpack.c.bf16 %v820_v10, %v820_v10  ;;  %1303 = vst.msk [vmem:[%s4287_s26 + $0x20] sm:$0xf] %vm1214_vm0, %v4381_v46  ;;  %v823_v49 = vmul.f32 0.17677669, %v3435_v47  ;;  %v4393_v50 = vpack.c.bf16 %v3467_v21, %v3467_v21  ;;  %1397 = vrot.lane.b32.xlu1 %v4310_v16, %s3875_s27 }
 0x277   : > { %v784_v52 = vpop.f32.mrf.mxu0  ;;  %v961_v53 = vpop.f32.mrf.mxu1 }
 0x278   : > { %1223 = vst.msk [vmem:[%s4295_s13 + $0x20] sm:$0xf] %vm1214_vm0, %v4388_v48  ;;  %v4400_v11 = vpack.c.bf16 %v823_v49, %v823_v49  ;;  %1306 = vst.msk [vmem:[%s4287_s26 + $0x2c] sm:$0xf] %vm1214_vm0, %v4393_v50  ;;  %v821_v13 = vmul.f32 0.17677669, %v784_v52  ;;  %v4405_v56 = vpack.c.bf16 %v961_v53, %v961_v53  ;;  %1651 = vrot.lane.b32.xlu0 %v4291_v2, %s3876_s15 }
 0x279   : > { %v3438_v57 = vpop.f32.mrf.mxu0  ;;  %v3470_v58 = vpop.f32.mrf.mxu1 }
 0x27a   : > { %1226 = vst.msk [vmem:[%s4295_s13 + $0x2c] sm:$0xf] %vm1214_vm0, %v4400_v11  ;;  %v4412_v29 = vpack.c.bf16 %v821_v13, %v821_v13  ;;  %1304 = vst.msk [vmem:[%s4287_s26 + $0x24] sm:$0xf] %vm1214_vm0, %v4405_v56  ;;  %v826_v25 = vmul.f32 0.17677669, %v3438_v57  ;;  %v4417_v36 = vpack.c.bf16 %v3470_v58, %v3470_v58  ;;  %1458 = vrot.lane.b32.xlu1 %v4314_v44, %s3875_s27 }
 0x27b   : > { %v797_v9 = vpop.f32.mrf.mxu0  ;;  %v974_v30 = vpop.f32.mrf.mxu1 }
 0x27c   : > { %1224 = vst.msk [vmem:[%s4295_s13 + $0x24] sm:$0xf] %vm1214_vm0, %v4412_v29  ;;  %v4424_v51 = vpack.c.bf16 %v826_v25, %v826_v25  ;;  %1309 = vst.msk [vmem:[%s4287_s26 + $0x38] sm:$0xf] %vm1214_vm0, %v4417_v36  ;;  %v824_v59 = vmul.f32 0.17677669, %v797_v9  ;;  %v4429_v60 = vpack.c.bf16 %v974_v30, %v974_v30  ;;  %1785 = vrot.lane.b32.xlu0 %v4284_v62, %s3877_s21 }
 0x27d   : > { %v3439_v61 = vpop.f32.mrf.mxu0  ;;  %v3471_v63 = vpop.f32.mrf.mxu1 }
 0x27e   : > { %1229 = vst.msk [vmem:[%s4295_s13 + $0x38] sm:$0xf] %vm1214_vm0, %v4424_v51  ;;  %v4436_v3 = vpack.c.bf16 %v824_v59, %v824_v59  ;;  %1307 = vst.msk [vmem:[%s4287_s26 + $0x30] sm:$0xf] %vm1214_vm0, %v4429_v60  ;;  %v827_v4 = vmul.f32 0.17677669, %v3439_v61  ;;  %v4441_v37 = vpack.c.bf16 %v3471_v63, %v3471_v63  ;;  %1592 = vrot.lane.b32.xlu1 %v4310_v16, %s3876_s15 }
 0x27f   : > { %v800_v6 = vpop.f32.mrf.mxu0  ;;  %v977_v62 = vpop.f32.mrf.mxu1 }
 0x280   : > { %1227 = vst.msk [vmem:[%s4295_s13 + $0x30] sm:$0xf] %vm1214_vm0, %v4436_v3  ;;  %v4448_v7 = vpack.c.bf16 %v827_v4, %v827_v4  ;;  %1310 = vst.msk [vmem:[%s4287_s26 + $0x3c] sm:$0xf] %vm1214_vm0, %v4441_v37  ;;  %v825_v8 = vmul.f32 0.17677669, %v800_v6  ;;  %v4453_v17 = vpack.c.bf16 %v977_v62, %v977_v62  ;;  %1846 = vrot.lane.b32.xlu0 %v4291_v2, %s3877_s21 }
 0x281   : > { %v3490_v18 = vpop.f32.mrf.mxu0  ;;  %v3498_v19 = vpop.f32.mrf.mxu1 }
 0x282   : > { %1230 = vst.msk [vmem:[%s4295_s13 + $0x3c] sm:$0xf] %vm1214_vm0, %v4448_v7  ;;  %v4460_v45 = vpack.c.bf16 %v825_v8, %v825_v8  ;;  %1308 = vst.msk [vmem:[%s4287_s26 + $0x34] sm:$0xf] %vm1214_vm0, %v4453_v17  ;;  %v4465_v24 = vpack.c.bf16 %v3490_v18, %v3490_v18  ;;  %v4467_v54 = vpack.c.bf16 %v3498_v19, %v3498_v19  ;;  %1653 = vrot.lane.b32.xlu1 %v4314_v44, %s3876_s15 }
 0x283   : > { %v1087_v38 = vpop.f32.mrf.mxu0  ;;  %v1119_v27 = vpop.f32.mrf.mxu1 }
 0x284   : > { %1228 = vst.msk [vmem:[%s4295_s13 + $0x34] sm:$0xf] %vm1214_vm0, %v4460_v45  ;;  %1377 = vst.msk [vmem:[%s4475_s3 + $0x8] sm:$0xf] %vm1214_vm0, %v4465_v24  ;;  %v4483_v2 = vpack.c.bf16 %v1087_v38, %v1087_v38  ;;  %v4485_v31 = vpack.c.bf16 %v1119_v27, %v1119_v27  ;;  %1391 = vrot.lane.b32.xlu0 %v4300_v5, %s3875_s27 }
 0x285   : > { %1385 = vst.msk [vmem:[%s4475_s3 + $0x28] sm:$0xf] %vm1214_vm0, %v4467_v54  ;;  %v3491_v14 = vpop.f32.mrf.mxu0  ;;  %v3499_v32 = vpop.f32.mrf.mxu1 }
 0x286   : > { %1375 = vst.msk [vmem:[%s4475_s3] sm:$0xf] %vm1214_vm0, %v4483_v2  ;;  %1383 = vst.msk [vmem:[%s4475_s3 + $0x20] sm:$0xf] %vm1214_vm0, %v4485_v31  ;;  %v4495_v33 = vpack.c.bf16 %v3491_v14, %v3491_v14  ;;  %v4497_v34 = vpack.c.bf16 %v3499_v32, %v3499_v32  ;;  %1787 = vrot.lane.b32.xlu1 %v4310_v16, %s3877_s21 }
 0x287   : > { %v1090_v35 = vpop.f32.mrf.mxu0  ;;  %v1122_v39 = vpop.f32.mrf.mxu1 }
 0x288   : > { %1378 = vst.msk [vmem:[%s4475_s3 + $0xc] sm:$0xf] %vm1214_vm0, %v4495_v33  ;;  %1386 = vst.msk [vmem:[%s4475_s3 + $0x2c] sm:$0xf] %vm1214_vm0, %v4497_v34  ;;  %v4507_v41 = vpack.c.bf16 %v1090_v35, %v1090_v35  ;;  %v4509_v43 = vpack.c.bf16 %v1122_v39, %v1122_v39  ;;  %1586 = vrot.lane.b32.xlu0 %v4300_v5, %s3876_s15 }
 0x289   : > { %v3494_v1 = vpop.f32.mrf.mxu0  ;;  %v3502_v16 = vpop.f32.mrf.mxu1 }
 0x28a   : > { %1376 = vst.msk [vmem:[%s4475_s3 + $0x4] sm:$0xf] %vm1214_vm0, %v4507_v41  ;;  %1384 = vst.msk [vmem:[%s4475_s3 + $0x24] sm:$0xf] %vm1214_vm0, %v4509_v43  ;;  %v4519_v10 = vpack.c.bf16 %v3494_v1, %v3494_v1  ;;  %v4521_v47 = vpack.c.bf16 %v3502_v16, %v3502_v16  ;;  %1848 = vrot.lane.b32.xlu1 %v4314_v44, %s3877_s21 }
 0x28b   : > { %v1103_v21 = vpop.f32.mrf.mxu0  ;;  %v1135_v49 = vpop.f32.mrf.mxu1 }
 0x28c   : > { %1381 = vst.msk [vmem:[%s4475_s3 + $0x18] sm:$0xf] %vm1214_vm0, %v4519_v10  ;;  %1389 = vst.msk [vmem:[%s4475_s3 + $0x38] sm:$0xf] %vm1214_vm0, %v4521_v47  ;;  %v4531_v52 = vpack.c.bf16 %v1103_v21, %v1103_v21  ;;  %v4533_v53 = vpack.c.bf16 %v1135_v49, %v1135_v49  ;;  %1781 = vrot.lane.b32.xlu0 %v4300_v5, %s3877_s21 }
 0x28d   : > { %v3495_v44 = vpop.f32.mrf.mxu0  ;;  %v3503_v13 = vpop.f32.mrf.mxu1 }
 0x28e   : > { %1379 = vst.msk [vmem:[%s4475_s3 + $0x10] sm:$0xf] %vm1214_vm0, %v4531_v52  ;;  %1387 = vst.msk [vmem:[%s4475_s3 + $0x30] sm:$0xf] %vm1214_vm0, %v4533_v53  ;;  %v4543_v57 = vpack.c.bf16 %v3495_v44, %v3495_v44  ;;  %v4545_v58 = vpack.c.bf16 %v3503_v13, %v3503_v13  ;;  %1393 = vrot.lane.b32.xlu1 %v4320_v22, %s3875_s27 }
 0x28f   : > { %v1106_v25 = vpop.f32.mrf.mxu0  ;;  %v1138_v9 = vpop.f32.mrf.mxu1 }
 0x290   : > { %1382 = vst.msk [vmem:[%s4475_s3 + $0x1c] sm:$0xf] %vm1214_vm0, %v4543_v57  ;;  %1390 = vst.msk [vmem:[%s4475_s3 + $0x3c] sm:$0xf] %vm1214_vm0, %v4545_v58  ;;  %v4555_v5 = vpack.c.bf16 %v1106_v25, %v1106_v25  ;;  %v4557_v30 = vpack.c.bf16 %v1138_v9, %v1138_v9  ;;  %1468 = vrot.lane.b32.xlu0 %v4325_v23, %s3875_s27 }
 0x292   : > { %1380 = vst.msk [vmem:[%s4475_s3 + $0x14] sm:$0xf] %vm1214_vm0, %v4555_v5  ;;  %1388 = vst.msk [vmem:[%s4475_s3 + $0x34] sm:$0xf] %vm1214_vm0, %v4557_v30  ;;  %1588 = vrot.lane.b32.xlu1 %v4320_v22, %s3876_s15 }
 0x294   : > { %1663 = vrot.lane.b32.xlu0 %v4325_v23, %s3876_s15 }
 0x296   : > { %1783 = vrot.lane.b32.xlu1 %v4320_v22, %s3877_s21 }
 0x298   : > { %1858 = vrot.lane.b32.xlu0 %v4325_v23, %s3877_s21 }
 0x29a   : > { %1470 = vrot.lane.b32.xlu1 %v4347_v15, %s3875_s27 }
 0x29c   : > { %1403 = vrot.lane.b32.xlu0 %v4331_v12, %s3875_s27 }
 0x29e   : > { %1665 = vrot.lane.b32.xlu1 %v4347_v15, %s3876_s15 }
 0x2a0   : > { %1464 = vrot.lane.b32.xlu0 %v4336_v26, %s3875_s27 }
 0x2a2   : > { %1860 = vrot.lane.b32.xlu1 %v4347_v15, %s3877_s21 }
 0x2a4   : > { %1598 = vrot.lane.b32.xlu0 %v4331_v12, %s3876_s15 }
 0x2a6   : > { %1405 = vrot.lane.b32.xlu1 %v4353_v55, %s3875_s27 }
 0x2a8   : > { %1659 = vrot.lane.b32.xlu0 %v4336_v26, %s3876_s15 }
 0x2aa   : > { %1466 = vrot.lane.b32.xlu1 %v4358_v0, %s3875_s27 }
 0x2ac   : > { %1793 = vrot.lane.b32.xlu0 %v4331_v12, %s3877_s21 }
 0x2ae   : > { %1600 = vrot.lane.b32.xlu1 %v4353_v55, %s3876_s15 }
 0x2b0   : > { %1854 = vrot.lane.b32.xlu0 %v4336_v26, %s3877_s21 }
 0x2b2   : > { %1661 = vrot.lane.b32.xlu1 %v4358_v0, %s3876_s15 }
 0x2b4   : > { %1399 = vrot.lane.b32.xlu0 %v4342_v20, %s3875_s27 }
 0x2b6   : > { %1795 = vrot.lane.b32.xlu1 %v4353_v55, %s3877_s21 }
 0x2b8   : > { %1594 = vrot.lane.b32.xlu0 %v4342_v20, %s3876_s15 }
 0x2ba   : > { %1856 = vrot.lane.b32.xlu1 %v4358_v0, %s3877_s21 }
 0x2bc   : > { %1789 = vrot.lane.b32.xlu0 %v4342_v20, %s3877_s21 }
 0x2be   : > { %1401 = vrot.lane.b32.xlu1 %v4365_v40, %s3875_s27 }
 0x2c0   : > { %1476 = vrot.lane.b32.xlu0 %v4370_v42, %s3875_s27 }
 0x2c2   : > { %1596 = vrot.lane.b32.xlu1 %v4365_v40, %s3876_s15 }
 0x2c4   : > { %1671 = vrot.lane.b32.xlu0 %v4370_v42, %s3876_s15 }
 0x2c6   : > { %1791 = vrot.lane.b32.xlu1 %v4365_v40, %s3877_s21 }
 0x2c8   : > { %1866 = vrot.lane.b32.xlu0 %v4370_v42, %s3877_s21 }
 0x2ca   : > { %1478 = vrot.lane.b32.xlu1 %v4393_v50, %s3875_s27 }
 0x2cc   : > { %1411 = vrot.lane.b32.xlu0 %v4376_v28, %s3875_s27 }
 0x2ce   : > { %1673 = vrot.lane.b32.xlu1 %v4393_v50, %s3876_s15 }
 0x2d0   : > { %1472 = vrot.lane.b32.xlu0 %v4381_v46, %s3875_s27 }
 0x2d2   : > { %1868 = vrot.lane.b32.xlu1 %v4393_v50, %s3877_s21 }
 0x2d4   : > { %1606 = vrot.lane.b32.xlu0 %v4376_v28, %s3876_s15 }
 0x2d6   : > { %1413 = vrot.lane.b32.xlu1 %v4400_v11, %s3875_s27  ;;  %v1461_v22 = vpop.permute.xlu0 %1460 }
 0x2d7   : > { %3172 = vst.msk [vmem:[%s4287_s26 + $0x48] sm:$0xf] %vm1214_vm0, %v1461_v22 }
 0x2d8   : > { %v1396_v23 = vpop.permute.xlu1 %1395  ;;  %1667 = vrot.lane.b32.xlu0 %v4381_v46, %s3876_s15 }
 0x2d9   : > { %3156 = vst.msk [vmem:[%s4295_s13 + $0x48] sm:$0xf] %vm1214_vm0, %v1396_v23 }
 0x2da   : > { %1474 = vrot.lane.b32.xlu1 %v4405_v56, %s3875_s27  ;;  %v1656_v12 = vpop.permute.xlu0 %1655 }
 0x2db   : > { %3220 = vst.msk [vmem:[%s4287_s26 + $0x88] sm:$0xf] %vm1214_vm0, %v1656_v12 }
 0x2dc   : > { %v1463_v26 = vpop.permute.xlu1 %1462  ;;  %1801 = vrot.lane.b32.xlu0 %v4376_v28, %s3877_s21 }
 0x2dd   : > { %3173 = vst.msk [vmem:[%s4287_s26 + $0x4c] sm:$0xf] %vm1214_vm0, %v1463_v26 }
 0x2de   : > { %1608 = vrot.lane.b32.xlu1 %v4400_v11, %s3876_s15  ;;  %v1851_v20 = vpop.permute.xlu0 %1850 }
 0x2df   : > { %3268 = vst.msk [vmem:[%s4287_s26 + $0xc8] sm:$0xf] %vm1214_vm0, %v1851_v20 }
 0x2e0   : > { %v1658_v15 = vpop.permute.xlu1 %1657  ;;  %1862 = vrot.lane.b32.xlu0 %v4381_v46, %s3877_s21 }
 0x2e1   : > { %3221 = vst.msk [vmem:[%s4287_s26 + $0x8c] sm:$0xf] %vm1214_vm0, %v1658_v15 }
 0x2e2   : > { %1669 = vrot.lane.b32.xlu1 %v4405_v56, %s3876_s15  ;;  %v1457_v55 = vpop.permute.xlu0 %1456 }
 0x2e3   : > { %3170 = vst.msk [vmem:[%s4287_s26 + $0x40] sm:$0xf] %vm1214_vm0, %v1457_v55 }
 0x2e4   : > { %v1853_v0 = vpop.permute.xlu1 %1852  ;;  %1407 = vrot.lane.b32.xlu0 %v4388_v48, %s3875_s27 }
 0x2e5   : > { %3269 = vst.msk [vmem:[%s4287_s26 + $0xcc] sm:$0xf] %vm1214_vm0, %v1853_v0 }
 0x2e6   : > { %1803 = vrot.lane.b32.xlu1 %v4400_v11, %s3877_s21  ;;  %v1591_v40 = vpop.permute.xlu0 %1590 }
 0x2e7   : > { %3204 = vst.msk [vmem:[%s4295_s13 + $0x88] sm:$0xf] %vm1214_vm0, %v1591_v40 }
 0x2e8   : > { %v1398_v42 = vpop.permute.xlu1 %1397  ;;  %1602 = vrot.lane.b32.xlu0 %v4388_v48, %s3876_s15 }
 0x2e9   : > { %3157 = vst.msk [vmem:[%s4295_s13 + $0x4c] sm:$0xf] %vm1214_vm0, %v1398_v42 }
 0x2ea   : > { %1864 = vrot.lane.b32.xlu1 %v4405_v56, %s3877_s21  ;;  %v1652_v28 = vpop.permute.xlu0 %1651 }
 0x2eb   : > { %3218 = vst.msk [vmem:[%s4287_s26 + $0x80] sm:$0xf] %vm1214_vm0, %v1652_v28 }
 0x2ec   : > { %v1459_v46 = vpop.permute.xlu1 %1458  ;;  %1797 = vrot.lane.b32.xlu0 %v4388_v48, %s3877_s21 }
 0x2ed   : > { %3171 = vst.msk [vmem:[%s4287_s26 + $0x44] sm:$0xf] %vm1214_vm0, %v1459_v46 }
 0x2ee   : > { %1409 = vrot.lane.b32.xlu1 %v4412_v29, %s3875_s27  ;;  %v1786_v50 = vpop.permute.xlu0 %1785 }
 0x2ef   : > { %3252 = vst.msk [vmem:[%s4295_s13 + $0xc8] sm:$0xf] %vm1214_vm0, %v1786_v50 }
 0x2f0   : > { %v1593_v11 = vpop.permute.xlu1 %1592  ;;  %1484 = vrot.lane.b32.xlu0 %v4417_v36, %s3875_s27 }
 0x2f1   : > { %3205 = vst.msk [vmem:[%s4295_s13 + $0x8c] sm:$0xf] %vm1214_vm0, %v1593_v11 }
 0x2f2   : > { %1604 = vrot.lane.b32.xlu1 %v4412_v29, %s3876_s15  ;;  %v1847_v48 = vpop.permute.xlu0 %1846 }
 0x2f3   : > { %3266 = vst.msk [vmem:[%s4287_s26 + $0xc0] sm:$0xf] %vm1214_vm0, %v1847_v48 }
 0x2f4   : > { %v1654_v56 = vpop.permute.xlu1 %1653  ;;  %1679 = vrot.lane.b32.xlu0 %v4417_v36, %s3876_s15 }
 0x2f5   : > { %3219 = vst.msk [vmem:[%s4287_s26 + $0x84] sm:$0xf] %vm1214_vm0, %v1654_v56 }
 0x2f6   : > { %1799 = vrot.lane.b32.xlu1 %v4412_v29, %s3877_s21  ;;  %v1392_v59 = vpop.permute.xlu0 %1391 }
 0x2f7   : > { %3154 = vst.msk [vmem:[%s4295_s13 + $0x40] sm:$0xf] %vm1214_vm0, %v1392_v59 }
 0x2f8   : > { %v1788_v61 = vpop.permute.xlu1 %1787  ;;  %1874 = vrot.lane.b32.xlu0 %v4417_v36, %s3877_s21 }
 0x2f9   : > { %3253 = vst.msk [vmem:[%s4295_s13 + $0xcc] sm:$0xf] %vm1214_vm0, %v1788_v61 }
 0x2fa   : > { %1486 = vrot.lane.b32.xlu1 %v4441_v37, %s3875_s27  ;;  %v1587_v63 = vpop.permute.xlu0 %1586 }
 0x2fb   : > { %3202 = vst.msk [vmem:[%s4295_s13 + $0x80] sm:$0xf] %vm1214_vm0, %v1587_v63 }
 0x2fc   : > { %v1849_v4 = vpop.permute.xlu1 %1848  ;;  %1419 = vrot.lane.b32.xlu0 %v4424_v51, %s3875_s27 }
 0x2fd   : > { %3267 = vst.msk [vmem:[%s4287_s26 + $0xc4] sm:$0xf] %vm1214_vm0, %v1849_v4 }
 0x2fe   : > { %1681 = vrot.lane.b32.xlu1 %v4441_v37, %s3876_s15  ;;  %v1782_v29 = vpop.permute.xlu0 %1781 }
 0x2ff   : > { %3250 = vst.msk [vmem:[%s4295_s13 + $0xc0] sm:$0xf] %vm1214_vm0, %v1782_v29 }
 0x300   : > { %v1394_v36 = vpop.permute.xlu1 %1393  ;;  %1480 = vrot.lane.b32.xlu0 %v4429_v60, %s3875_s27 }
 0x301   : > { %3155 = vst.msk [vmem:[%s4295_s13 + $0x44] sm:$0xf] %vm1214_vm0, %v1394_v36 }
 0x302   : > { %1876 = vrot.lane.b32.xlu1 %v4441_v37, %s3877_s21  ;;  %v1469_v6 = vpop.permute.xlu0 %1468 }
 0x303   : > { %3176 = vst.msk [vmem:[%s4287_s26 + $0x58] sm:$0xf] %vm1214_vm0, %v1469_v6 }
 0x304   : > { %v1589_v62 = vpop.permute.xlu1 %1588  ;;  %1614 = vrot.lane.b32.xlu0 %v4424_v51, %s3876_s15 }
 0x305   : > { %3203 = vst.msk [vmem:[%s4295_s13 + $0x84] sm:$0xf] %vm1214_vm0, %v1589_v62 }
 0x306   : > { %1421 = vrot.lane.b32.xlu1 %v4448_v7, %s3875_s27  ;;  %v1664_v8 = vpop.permute.xlu0 %1663 }
 0x307   : > { %3224 = vst.msk [vmem:[%s4287_s26 + $0x98] sm:$0xf] %vm1214_vm0, %v1664_v8 }
 0x308   : > { %v1784_v18 = vpop.permute.xlu1 %1783  ;;  %1675 = vrot.lane.b32.xlu0 %v4429_v60, %s3876_s15 }
 0x309   : > { %3251 = vst.msk [vmem:[%s4295_s13 + $0xc4] sm:$0xf] %vm1214_vm0, %v1784_v18 }
 0x30a   : > { %1482 = vrot.lane.b32.xlu1 %v4453_v17, %s3875_s27  ;;  %v1859_v37 = vpop.permute.xlu0 %1858 }
 0x30b   : > { %3272 = vst.msk [vmem:[%s4287_s26 + $0xd8] sm:$0xf] %vm1214_vm0, %v1859_v37 }
 0x30c   : > { %v1471_v19 = vpop.permute.xlu1 %1470  ;;  %1809 = vrot.lane.b32.xlu0 %v4424_v51, %s3877_s21 }
 0x30d   : > { %3177 = vst.msk [vmem:[%s4287_s26 + $0x5c] sm:$0xf] %vm1214_vm0, %v1471_v19 }
 0x30e   : > { %1616 = vrot.lane.b32.xlu1 %v4448_v7, %s3876_s15  ;;  %v1404_v38 = vpop.permute.xlu0 %1403 }
 0x30f   : > { %3160 = vst.msk [vmem:[%s4295_s13 + $0x58] sm:$0xf] %vm1214_vm0, %v1404_v38 }
 0x310   : > { %v1666_v27 = vpop.permute.xlu1 %1665  ;;  %1870 = vrot.lane.b32.xlu0 %v4429_v60, %s3877_s21 }
 0x311   : > { %3225 = vst.msk [vmem:[%s4287_s26 + $0x9c] sm:$0xf] %vm1214_vm0, %v1666_v27 }
 0x312   : > { %1677 = vrot.lane.b32.xlu1 %v4453_v17, %s3876_s15  ;;  %v1465_v51 = vpop.permute.xlu0 %1464 }
 0x313   : > { %3174 = vst.msk [vmem:[%s4287_s26 + $0x50] sm:$0xf] %vm1214_vm0, %v1465_v51 }
 0x314   : > { %v1861_v14 = vpop.permute.xlu1 %1860  ;;  %1415 = vrot.lane.b32.xlu0 %v4436_v3, %s3875_s27 }
 0x315   : > { %3273 = vst.msk [vmem:[%s4287_s26 + $0xdc] sm:$0xf] %vm1214_vm0, %v1861_v14 }
 0x316   : > { %1811 = vrot.lane.b32.xlu1 %v4448_v7, %s3877_s21  ;;  %v1599_v60 = vpop.permute.xlu0 %1598 }
 0x317   : > { %3208 = vst.msk [vmem:[%s4295_s13 + $0x98] sm:$0xf] %vm1214_vm0, %v1599_v60 }
 0x318   : > { %v1406_v32 = vpop.permute.xlu1 %1405  ;;  %1610 = vrot.lane.b32.xlu0 %v4436_v3, %s3876_s15 }
 0x319   : > { %3161 = vst.msk [vmem:[%s4295_s13 + $0x5c] sm:$0xf] %vm1214_vm0, %v1406_v32 }
 0x31a   : > { %1872 = vrot.lane.b32.xlu1 %v4453_v17, %s3877_s21  ;;  %v1660_v35 = vpop.permute.xlu0 %1659 }
 0x31b   : > { %3222 = vst.msk [vmem:[%s4287_s26 + $0x90] sm:$0xf] %vm1214_vm0, %v1660_v35 }
 0x31c   : > { %v1467_v39 = vpop.permute.xlu1 %1466  ;;  %1805 = vrot.lane.b32.xlu0 %v4436_v3, %s3877_s21 }
 0x31d   : > { %3175 = vst.msk [vmem:[%s4287_s26 + $0x54] sm:$0xf] %vm1214_vm0, %v1467_v39 }
 0x31e   : > { %1417 = vrot.lane.b32.xlu1 %v4460_v45, %s3875_s27  ;;  %v1794_v7 = vpop.permute.xlu0 %1793 }
 0x31f   : > { %3256 = vst.msk [vmem:[%s4295_s13 + $0xd8] sm:$0xf] %vm1214_vm0, %v1794_v7 }
 0x320   : > { %v1601_v1 = vpop.permute.xlu1 %1600  ;;  %1525 = vrot.lane.b32.xlu0 %v4465_v24, %s3875_s27 }
 0x321   : > { %3209 = vst.msk [vmem:[%s4295_s13 + $0x9c] sm:$0xf] %vm1214_vm0, %v1601_v1 }
 0x322   : > { %1612 = vrot.lane.b32.xlu1 %v4460_v45, %s3876_s15  ;;  %v1855_v3 = vpop.permute.xlu0 %1854 }
 0x323   : > { %3270 = vst.msk [vmem:[%s4287_s26 + $0xd0] sm:$0xf] %vm1214_vm0, %v1855_v3 }
 0x324   : > { %v1662_v17 = vpop.permute.xlu1 %1661  ;;  %1541 = vrot.lane.b32.xlu0 %v4467_v54, %s3875_s27 }
 0x325   : > { %3223 = vst.msk [vmem:[%s4287_s26 + $0x94] sm:$0xf] %vm1214_vm0, %v1662_v17 }
 0x326   : > { %1807 = vrot.lane.b32.xlu1 %v4460_v45, %s3877_s21  ;;  %v1400_v16 = vpop.permute.xlu0 %1399 }
 0x327   : > { %3158 = vst.msk [vmem:[%s4295_s13 + $0x50] sm:$0xf] %vm1214_vm0, %v1400_v16 }
 0x328   : > { %v1796_v21 = vpop.permute.xlu1 %1795  ;;  %1720 = vrot.lane.b32.xlu0 %v4465_v24, %s3876_s15 }
 0x329   : > { %3257 = vst.msk [vmem:[%s4295_s13 + $0xdc] sm:$0xf] %vm1214_vm0, %v1796_v21 }
 0x32a   : > { %1527 = vrot.lane.b32.xlu1 %v4495_v33, %s3875_s27  ;;  %v1595_v49 = vpop.permute.xlu0 %1594 }
 0x32b   : > { %3206 = vst.msk [vmem:[%s4295_s13 + $0x90] sm:$0xf] %vm1214_vm0, %v1595_v49 }
 0x32c   : > { %v1857_v44 = vpop.permute.xlu1 %1856  ;;  %1736 = vrot.lane.b32.xlu0 %v4467_v54, %s3876_s15 }
 0x32d   : > { %3271 = vst.msk [vmem:[%s4287_s26 + $0xd4] sm:$0xf] %vm1214_vm0, %v1857_v44 }
 0x32e   : > { %1543 = vrot.lane.b32.xlu1 %v4497_v34, %s3875_s27  ;;  %v1790_v45 = vpop.permute.xlu0 %1789 }
 0x32f   : > { %3254 = vst.msk [vmem:[%s4295_s13 + $0xd0] sm:$0xf] %vm1214_vm0, %v1790_v45 }
 0x330   : > { %v1402_v13 = vpop.permute.xlu1 %1401  ;;  %1915 = vrot.lane.b32.xlu0 %v4465_v24, %s3877_s21 }
 0x331   : > { %3159 = vst.msk [vmem:[%s4295_s13 + $0x54] sm:$0xf] %vm1214_vm0, %v1402_v13 }
 0x332   : > { %1722 = vrot.lane.b32.xlu1 %v4495_v33, %s3876_s15  ;;  %v1477_v25 = vpop.permute.xlu0 %1476 }
 0x333   : > { %3180 = vst.msk [vmem:[%s4287_s26 + $0x68] sm:$0xf] %vm1214_vm0, %v1477_v25 }
 0x334   : > { %v1597_v9 = vpop.permute.xlu1 %1596  ;;  %1931 = vrot.lane.b32.xlu0 %v4467_v54, %s3877_s21 }
 0x335   : > { %3207 = vst.msk [vmem:[%s4295_s13 + $0x94] sm:$0xf] %vm1214_vm0, %v1597_v9 }
 0x336   : > { %1738 = vrot.lane.b32.xlu1 %v4497_v34, %s3876_s15  ;;  %v1672_v24 = vpop.permute.xlu0 %1671 }
 0x337   : > { %3228 = vst.msk [vmem:[%s4287_s26 + $0xa8] sm:$0xf] %vm1214_vm0, %v1672_v24 }
 0x338   : > { %v1792_v22 = vpop.permute.xlu1 %1791  ;;  %1521 = vrot.lane.b32.xlu0 %v4483_v2, %s3875_s27 }
 0x339   : > { %3255 = vst.msk [vmem:[%s4295_s13 + $0xd4] sm:$0xf] %vm1214_vm0, %v1792_v22 }
 0x33a   : > { %1917 = vrot.lane.b32.xlu1 %v4495_v33, %s3877_s21  ;;  %v1867_v54 = vpop.permute.xlu0 %1866 }
 0x33b   : > { %3276 = vst.msk [vmem:[%s4287_s26 + $0xe8] sm:$0xf] %vm1214_vm0, %v1867_v54 }
 0x33c   : > { %v1479_v23 = vpop.permute.xlu1 %1478  ;;  %1537 = vrot.lane.b32.xlu0 %v4485_v31, %s3875_s27 }
 0x33d   : > { %3181 = vst.msk [vmem:[%s4287_s26 + $0x6c] sm:$0xf] %vm1214_vm0, %v1479_v23 }
 0x33e   : > { %1933 = vrot.lane.b32.xlu1 %v4497_v34, %s3877_s21  ;;  %v1412_v12 = vpop.permute.xlu0 %1411 }
 0x33f   : > { %3164 = vst.msk [vmem:[%s4295_s13 + $0x68] sm:$0xf] %vm1214_vm0, %v1412_v12 }
 0x340   : > { %v1674_v26 = vpop.permute.xlu1 %1673  ;;  %1716 = vrot.lane.b32.xlu0 %v4483_v2, %s3876_s15 }
 0x341   : > { %3229 = vst.msk [vmem:[%s4287_s26 + $0xac] sm:$0xf] %vm1214_vm0, %v1674_v26 }
 0x342   : > { %1523 = vrot.lane.b32.xlu1 %v4507_v41, %s3875_s27  ;;  %v1473_v33 = vpop.permute.xlu0 %1472 }
 0x343   : > { %3178 = vst.msk [vmem:[%s4287_s26 + $0x60] sm:$0xf] %vm1214_vm0, %v1473_v33 }
 0x344   : > { %v1869_v20 = vpop.permute.xlu1 %1868  ;;  %1732 = vrot.lane.b32.xlu0 %v4485_v31, %s3876_s15 }
 0x345   : > { %3277 = vst.msk [vmem:[%s4287_s26 + $0xec] sm:$0xf] %vm1214_vm0, %v1869_v20 }
 0x346   : > { %1539 = vrot.lane.b32.xlu1 %v4509_v43, %s3875_s27  ;;  %v1607_v34 = vpop.permute.xlu0 %1606 }
 0x347   : > { %3212 = vst.msk [vmem:[%s4295_s13 + $0xa8] sm:$0xf] %vm1214_vm0, %v1607_v34 }
 0x348   : > { %v1414_v15 = vpop.permute.xlu1 %1413  ;;  %1911 = vrot.lane.b32.xlu0 %v4483_v2, %s3877_s21 }
 0x349   : > { %3165 = vst.msk [vmem:[%s4295_s13 + $0x6c] sm:$0xf] %vm1214_vm0, %v1414_v15 }
 0x34a   : > { %1718 = vrot.lane.b32.xlu1 %v4507_v41, %s3876_s15  ;;  %v1668_v55 = vpop.permute.xlu0 %1667 }
 0x34b   : > { %3226 = vst.msk [vmem:[%s4287_s26 + $0xa0] sm:$0xf] %vm1214_vm0, %v1668_v55 }
 0x34c   : > { %v1475_v0 = vpop.permute.xlu1 %1474  ;;  %1927 = vrot.lane.b32.xlu0 %v4485_v31, %s3877_s21 }
 0x34d   : > { %3179 = vst.msk [vmem:[%s4287_s26 + $0x64] sm:$0xf] %vm1214_vm0, %v1475_v0 }
 0x34e   : > { %1734 = vrot.lane.b32.xlu1 %v4509_v43, %s3876_s15  ;;  %v1802_v2 = vpop.permute.xlu0 %1801 }
 0x34f   : > { %3260 = vst.msk [vmem:[%s4295_s13 + $0xe8] sm:$0xf] %vm1214_vm0, %v1802_v2 }
 0x350   : > { %v1609_v40 = vpop.permute.xlu1 %1608  ;;  %1533 = vrot.lane.b32.xlu0 %v4519_v10, %s3875_s27 }
 0x351   : > { %3213 = vst.msk [vmem:[%s4295_s13 + $0xac] sm:$0xf] %vm1214_vm0, %v1609_v40 }
 0x352   : > { %1913 = vrot.lane.b32.xlu1 %v4507_v41, %s3877_s21  ;;  %v1863_v31 = vpop.permute.xlu0 %1862 }
 0x353   : > { %3274 = vst.msk [vmem:[%s4287_s26 + $0xe0] sm:$0xf] %vm1214_vm0, %v1863_v31 }
 0x354   : > { %v1670_v42 = vpop.permute.xlu1 %1669  ;;  %1549 = vrot.lane.b32.xlu0 %v4521_v47, %s3875_s27 }
 0x355   : > { %3227 = vst.msk [vmem:[%s4287_s26 + $0xa4] sm:$0xf] %vm1214_vm0, %v1670_v42 }
 0x356   : > { %1929 = vrot.lane.b32.xlu1 %v4509_v43, %s3877_s21  ;;  %v1408_v28 = vpop.permute.xlu0 %1407 }
 0x357   : > { %3162 = vst.msk [vmem:[%s4295_s13 + $0x60] sm:$0xf] %vm1214_vm0, %v1408_v28 }
 0x358   : > { %v1804_v46 = vpop.permute.xlu1 %1803  ;;  %1728 = vrot.lane.b32.xlu0 %v4519_v10, %s3876_s15 }
 0x359   : > { %3261 = vst.msk [vmem:[%s4295_s13 + $0xec] sm:$0xf] %vm1214_vm0, %v1804_v46 }
 0x35a   : > { %1535 = vrot.lane.b32.xlu1 %v4543_v57, %s3875_s27  ;;  %v1603_v41 = vpop.permute.xlu0 %1602 }
 0x35b   : > { %3210 = vst.msk [vmem:[%s4295_s13 + $0xa0] sm:$0xf] %vm1214_vm0, %v1603_v41 }
 0x35c   : > { %v1865_v50 = vpop.permute.xlu1 %1864  ;;  %1744 = vrot.lane.b32.xlu0 %v4521_v47, %s3876_s15 }
 0x35d   : > { %3275 = vst.msk [vmem:[%s4287_s26 + $0xe4] sm:$0xf] %vm1214_vm0, %v1865_v50 }
 0x35e   : > { %1551 = vrot.lane.b32.xlu1 %v4545_v58, %s3875_s27  ;;  %v1798_v43 = vpop.permute.xlu0 %1797 }
 0x35f   : > { %3258 = vst.msk [vmem:[%s4295_s13 + $0xe0] sm:$0xf] %vm1214_vm0, %v1798_v43 }
 0x360   : > { %v1410_v11 = vpop.permute.xlu1 %1409  ;;  %1923 = vrot.lane.b32.xlu0 %v4519_v10, %s3877_s21 }
 0x361   : > { %3163 = vst.msk [vmem:[%s4295_s13 + $0x64] sm:$0xf] %vm1214_vm0, %v1410_v11 }
 0x362   : > { %1730 = vrot.lane.b32.xlu1 %v4543_v57, %s3876_s15  ;;  %v1485_v48 = vpop.permute.xlu0 %1484 }
 0x363   : > { %3184 = vst.msk [vmem:[%s4287_s26 + $0x78] sm:$0xf] %vm1214_vm0, %v1485_v48 }
 0x364   : > { %v1605_v56 = vpop.permute.xlu1 %1604  ;;  %1529 = vrot.lane.b32.xlu0 %v4531_v52, %s3875_s27 }
 0x365   : > { %3211 = vst.msk [vmem:[%s4295_s13 + $0xa4] sm:$0xf] %vm1214_vm0, %v1605_v56 }
 0x366   : > { %1746 = vrot.lane.b32.xlu1 %v4545_v58, %s3876_s15  ;;  %v1680_v10 = vpop.permute.xlu0 %1679 }
 0x367   : > { %3232 = vst.msk [vmem:[%s4287_s26 + $0xb8] sm:$0xf] %vm1214_vm0, %v1680_v10 }
 0x368   : > { %v1800_v59 = vpop.permute.xlu1 %1799  ;;  %1545 = vrot.lane.b32.xlu0 %v4533_v53, %s3875_s27 }
 0x369   : > { %3259 = vst.msk [vmem:[%s4295_s13 + $0xe4] sm:$0xf] %vm1214_vm0, %v1800_v59 }
 0x36a   : > { %1925 = vrot.lane.b32.xlu1 %v4543_v57, %s3877_s21  ;;  %v1875_v61 = vpop.permute.xlu0 %1874 }
 0x36b   : > { %3280 = vst.msk [vmem:[%s4287_s26 + $0xf8] sm:$0xf] %vm1214_vm0, %v1875_v61 }
 0x36c   : > { %v1487_v63 = vpop.permute.xlu1 %1486  ;;  %1724 = vrot.lane.b32.xlu0 %v4531_v52, %s3876_s15 }
 0x36d   : > { %3185 = vst.msk [vmem:[%s4287_s26 + $0x7c] sm:$0xf] %vm1214_vm0, %v1487_v63 }
 0x36e   : > { %1531 = vrot.lane.b32.xlu1 %v4555_v5, %s3875_s27  ;;  %v1420_v4 = vpop.permute.xlu0 %1419 }
 0x36f   : > { %3168 = vst.msk [vmem:[%s4295_s13 + $0x78] sm:$0xf] %vm1214_vm0, %v1420_v4 }
 0x370   : > { %v1682_v29 = vpop.permute.xlu1 %1681  ;;  %1740 = vrot.lane.b32.xlu0 %v4533_v53, %s3876_s15 }
 0x371   : > { %3233 = vst.msk [vmem:[%s4287_s26 + $0xbc] sm:$0xf] %vm1214_vm0, %v1682_v29 }
 0x372   : > { %1547 = vrot.lane.b32.xlu1 %v4557_v30, %s3875_s27  ;;  %v1481_v57 = vpop.permute.xlu0 %1480 }
 0x373   : > { %3182 = vst.msk [vmem:[%s4287_s26 + $0x70] sm:$0xf] %vm1214_vm0, %v1481_v57 }
 0x374   : > { %v1877_v36 = vpop.permute.xlu1 %1876  ;;  %1919 = vrot.lane.b32.xlu0 %v4531_v52, %s3877_s21 }
 0x375   : > { %3281 = vst.msk [vmem:[%s4287_s26 + $0xfc] sm:$0xf] %vm1214_vm0, %v1877_v36 }
 0x376   : > { %1726 = vrot.lane.b32.xlu1 %v4555_v5, %s3876_s15  ;;  %v1615_v6 = vpop.permute.xlu0 %1614 }
 0x377   : > { %3216 = vst.msk [vmem:[%s4295_s13 + $0xb8] sm:$0xf] %vm1214_vm0, %v1615_v6  ;;  %v2012_v6 = vld [vmem:[%s4295_s13] sm:$0xff] (%p4034_p0)  }
 0x378   : > { %v1422_v62 = vpop.permute.xlu1 %1421  ;;  %1935 = vrot.lane.b32.xlu0 %v4533_v53, %s3877_s21  ;;  %2013 = vst [vmem:[%s5113_s30] sm:$0xff] (%p4034_p0), %v2012_v6  }
 0x379   : > { %3169 = vst.msk [vmem:[%s4295_s13 + $0x7c] sm:$0xf] %vm1214_vm0, %v1422_v62  ;;  %v2016_v62 = vld [vmem:[%s4295_s13 + $0x8] sm:$0xff] (%p4034_p0)  }
 0x37a   : > { %1742 = vrot.lane.b32.xlu1 %v4557_v30, %s3876_s15  ;;  %v1676_v52 = vpop.permute.xlu0 %1675  ;;  %2017 = vst [vmem:[%s5113_s30 + $0x8] sm:$0xff] (%p4034_p0), %v2016_v62  }
 0x37b   : > { %3230 = vst.msk [vmem:[%s4287_s26 + $0xb0] sm:$0xf] %vm1214_vm0, %v1676_v52  ;;  %v2020_v52 = vld [vmem:[%s4295_s13 + $0x10] sm:$0xff] (%p4034_p0)  }
 0x37c   : > { %v1483_v8 = vpop.permute.xlu1 %1482  ;;  %1939 = vrot.lane.b32.xlu0 %v4521_v47, %s3877_s21  ;;  %2021 = vst [vmem:[%s5113_s30 + $0x10] sm:$0xff] (%p4034_p0), %v2020_v52  }
 0x37d   : > { %3183 = vst.msk [vmem:[%s4287_s26 + $0x74] sm:$0xf] %vm1214_vm0, %v1483_v8  ;;  %v2024_v8 = vld [vmem:[%s4295_s13 + $0x18] sm:$0xff] (%p4034_p0)  }
 0x37e   : > { %1921 = vrot.lane.b32.xlu1 %v4555_v5, %s3877_s21  ;;  %v1810_v53 = vpop.permute.xlu0 %1809  ;;  %2025 = vst [vmem:[%s5113_s30 + $0x18] sm:$0xff] (%p4034_p0), %v2024_v8  }
 0x37f   : > { %3264 = vst.msk [vmem:[%s4295_s13 + $0xf8] sm:$0xf] %vm1214_vm0, %v1810_v53  ;;  %v2028_v53 = vld [vmem:[%s4295_s13 + $0x20] sm:$0xff] (%p4034_p0)  }
 0x380   : > { %v1617_v18 = vpop.permute.xlu1 %1616  ;;  %2029 = vst [vmem:[%s5113_s30 + $0x20] sm:$0xff] (%p4034_p0), %v2028_v53  }
 0x381   : > { %3217 = vst.msk [vmem:[%s4295_s13 + $0xbc] sm:$0xf] %vm1214_vm0, %v1617_v18  ;;  %v2032_v18 = vld [vmem:[%s4295_s13 + $0x28] sm:$0xff] (%p4034_p0)  }
 0x382   : > { %1937 = vrot.lane.b32.xlu1 %v4557_v30, %s3877_s21  ;;  %v1871_v37 = vpop.permute.xlu0 %1870  ;;  %2033 = vst [vmem:[%s5113_s30 + $0x28] sm:$0xff] (%p4034_p0), %v2032_v18  }
 0x383   : > { %3278 = vst.msk [vmem:[%s4287_s26 + $0xf0] sm:$0xf] %vm1214_vm0, %v1871_v37  ;;  %v2036_v37 = vld [vmem:[%s4295_s13 + $0x30] sm:$0xff] (%p4034_p0)  }
 0x384   : > { %v1678_v47 = vpop.permute.xlu1 %1677  ;;  %2037 = vst [vmem:[%s5113_s30 + $0x30] sm:$0xff] (%p4034_p0), %v2036_v37  }
 0x385   : > { %3231 = vst.msk [vmem:[%s4287_s26 + $0xb4] sm:$0xf] %vm1214_vm0, %v1678_v47  ;;  %v2040_v47 = vld [vmem:[%s4295_s13 + $0x38] sm:$0xff] (%p4034_p0)  }
 0x386   : > { %1941 = vrot.lane.b32.xlu1 %v4545_v58, %s3877_s21  ;;  %v1416_v5 = vpop.permute.xlu0 %1415  ;;  %2041 = vst [vmem:[%s5113_s30 + $0x38] sm:$0xff] (%p4034_p0), %v2040_v47  }
 0x387   : > { %3166 = vst.msk [vmem:[%s4295_s13 + $0x70] sm:$0xf] %vm1214_vm0, %v1416_v5  ;;  %v2044_v5 = vld [vmem:[%s4295_s13 + $0x40] sm:$0xff] (%p4034_p0)  }
 0x388   : > { %v1812_v19 = vpop.permute.xlu1 %1811  ;;  %2045 = vst [vmem:[%s5113_s30 + $0x80] sm:$0xff] (%p4034_p0), %v2044_v5  }
 0x389   : > { %3265 = vst.msk [vmem:[%s4295_s13 + $0xfc] sm:$0xf] %vm1214_vm0, %v1812_v19  ;;  %v2048_v19 = vld [vmem:[%s4295_s13 + $0x48] sm:$0xff] (%p4034_p0)  }
 0x38a   : > { %v1611_v30 = vpop.permute.xlu0 %1610  ;;  %2049 = vst [vmem:[%s5113_s30 + $0x88] sm:$0xff] (%p4034_p0), %v2048_v19  }
 0x38b   : > { %3214 = vst.msk [vmem:[%s4295_s13 + $0xb0] sm:$0xf] %vm1214_vm0, %v1611_v30  ;;  %v2052_v30 = vld [vmem:[%s4295_s13 + $0x50] sm:$0xff] (%p4034_p0)  }
 0x38c   : > { %v1873_v38 = vpop.permute.xlu1 %1872  ;;  %2053 = vst [vmem:[%s5113_s30 + $0x90] sm:$0xff] (%p4034_p0), %v2052_v30  }
 0x38d   : > { %3279 = vst.msk [vmem:[%s4287_s26 + $0xf4] sm:$0xf] %vm1214_vm0, %v1873_v38  ;;  %v2056_v38 = vld [vmem:[%s4295_s13 + $0x58] sm:$0xff] (%p4034_p0)  }
 0x38e   : > { %v1806_v27 = vpop.permute.xlu0 %1805  ;;  %2057 = vst [vmem:[%s5113_s30 + $0x98] sm:$0xff] (%p4034_p0), %v2056_v38  }
 0x38f   : > { %3262 = vst.msk [vmem:[%s4295_s13 + $0xf0] sm:$0xf] %vm1214_vm0, %v1806_v27  ;;  %v2060_v27 = vld [vmem:[%s4295_s13 + $0x60] sm:$0xff] (%p4034_p0)  }
 0x390   : > { %v1418_v58 = vpop.permute.xlu1 %1417  ;;  %2061 = vst [vmem:[%s5113_s30 + $0xa0] sm:$0xff] (%p4034_p0), %v2060_v27  }
 0x391   : > { %3167 = vst.msk [vmem:[%s4295_s13 + $0x74] sm:$0xf] %vm1214_vm0, %v1418_v58  ;;  %v2064_v58 = vld [vmem:[%s4295_s13 + $0x68] sm:$0xff] (%p4034_p0)  }
 0x392   : > { %v1526_v51 = vpop.permute.xlu0 %1525  ;;  %2065 = vst [vmem:[%s5113_s30 + $0xa8] sm:$0xff] (%p4034_p0), %v2064_v58  }
 0x393   : > { %3188 = vst.msk [vmem:[%s4475_s3 + $0x48] sm:$0xf] %vm1214_vm0, %v1526_v51 }
 0x394   : > { %v1613_v14 = vpop.permute.xlu1 %1612 }
 0x395   : > { %3215 = vst.msk [vmem:[%s4295_s13 + $0xb4] sm:$0xf] %vm1214_vm0, %v1613_v14  ;;  %v2072_v14 = vld [vmem:[%s4295_s13 + $0x78] sm:$0xff] (%p4034_p0)  }
 0x396   : > { %v1542_v60 = vpop.permute.xlu0 %1541  ;;  %2073 = vst [vmem:[%s5113_s30 + $0xb8] sm:$0xff] (%p4034_p0), %v2072_v14  }
 0x397   : > { %3196 = vst.msk [vmem:[%s4475_s3 + $0x68] sm:$0xf] %vm1214_vm0, %v1542_v60  ;;  %v2076_v60 = vld [vmem:[%s4295_s13 + $0x80] sm:$0xff] (%p4034_p0)  }
 0x398   : > { %v1808_v32 = vpop.permute.xlu1 %1807  ;;  %v2068_v51 = vld [vmem:[%s4295_s13 + $0x70] sm:$0xff] (%p4034_p0)   ;;  %2077 = vst [vmem:[%s5113_s30 + $0x100] sm:$0xff] (%p4034_p0), %v2076_v60  }
 0x399   : > { %3263 = vst.msk [vmem:[%s4295_s13 + $0xf4] sm:$0xf] %vm1214_vm0, %v1808_v32  ;;  %2069 = vst [vmem:[%s5113_s30 + $0xb0] sm:$0xff] (%p4034_p0), %v2068_v51   ;;  %v2080_v32 = vld [vmem:[%s4295_s13 + $0x88] sm:$0xff] (%p4034_p0)  }
 0x39a   : > { %v1721_v35 = vpop.permute.xlu0 %1720  ;;  %2081 = vst [vmem:[%s5113_s30 + $0x108] sm:$0xff] (%p4034_p0), %v2080_v32  }
 0x39b   : > { %3236 = vst.msk [vmem:[%s4475_s3 + $0x88] sm:$0xf] %vm1214_vm0, %v1721_v35  ;;  %v2084_v35 = vld [vmem:[%s4295_s13 + $0x90] sm:$0xff] (%p4034_p0)  }
 0x39c   : > { %v1528_v39 = vpop.permute.xlu1 %1527  ;;  %2085 = vst [vmem:[%s5113_s30 + $0x110] sm:$0xff] (%p4034_p0), %v2084_v35  }
 0x39d   : > { %3189 = vst.msk [vmem:[%s4475_s3 + $0x4c] sm:$0xf] %vm1214_vm0, %v1528_v39  ;;  %v2088_v39 = vld [vmem:[%s4295_s13 + $0x98] sm:$0xff] (%p4034_p0)  }
 0x39e   : > { %v1737_v7 = vpop.permute.xlu0 %1736  ;;  %2089 = vst [vmem:[%s5113_s30 + $0x118] sm:$0xff] (%p4034_p0), %v2088_v39  }
 0x39f   : > { %3244 = vst.msk [vmem:[%s4475_s3 + $0xa8] sm:$0xf] %vm1214_vm0, %v1737_v7  ;;  %v2092_v7 = vld [vmem:[%s4295_s13 + $0xa0] sm:$0xff] (%p4034_p0)  }
 0x3a0   : > { %v1544_v1 = vpop.permute.xlu1 %1543  ;;  %2093 = vst [vmem:[%s5113_s30 + $0x120] sm:$0xff] (%p4034_p0), %v2092_v7  }
 0x3a1   : > { %3197 = vst.msk [vmem:[%s4475_s3 + $0x6c] sm:$0xf] %vm1214_vm0, %v1544_v1  ;;  %v2096_v1 = vld [vmem:[%s4295_s13 + $0xa8] sm:$0xff] (%p4034_p0)  }
 0x3a2   : > { %v1916_v3 = vpop.permute.xlu0 %1915  ;;  %2097 = vst [vmem:[%s5113_s30 + $0x128] sm:$0xff] (%p4034_p0), %v2096_v1  }
 0x3a3   : > { %3284 = vst.msk [vmem:[%s4475_s3 + $0xc8] sm:$0xf] %vm1214_vm0, %v1916_v3  ;;  %v2100_v3 = vld [vmem:[%s4295_s13 + $0xb0] sm:$0xff] (%p4034_p0)  }
 0x3a4   : > { %v1723_v17 = vpop.permute.xlu1 %1722  ;;  %2101 = vst [vmem:[%s5113_s30 + $0x130] sm:$0xff] (%p4034_p0), %v2100_v3  }
 0x3a5   : > { %3237 = vst.msk [vmem:[%s4475_s3 + $0x8c] sm:$0xf] %vm1214_vm0, %v1723_v17  ;;  %v2104_v17 = vld [vmem:[%s4295_s13 + $0xb8] sm:$0xff] (%p4034_p0)  }
 0x3a6   : > { %v1932_v16 = vpop.permute.xlu0 %1931  ;;  %2105 = vst [vmem:[%s5113_s30 + $0x138] sm:$0xff] (%p4034_p0), %v2104_v17  }
 0x3a7   : > { %3292 = vst.msk [vmem:[%s4475_s3 + $0xe8] sm:$0xf] %vm1214_vm0, %v1932_v16  ;;  %v2108_v16 = vld [vmem:[%s4295_s13 + $0xc0] sm:$0xff] (%p4034_p0)  }
 0x3a8   : > { %v1739_v21 = vpop.permute.xlu1 %1738  ;;  %2109 = vst [vmem:[%s5113_s30 + $0x180] sm:$0xff] (%p4034_p0), %v2108_v16  }
 0x3a9   : > { %3245 = vst.msk [vmem:[%s4475_s3 + $0xac] sm:$0xf] %vm1214_vm0, %v1739_v21  ;;  %v2112_v21 = vld [vmem:[%s4295_s13 + $0xc8] sm:$0xff] (%p4034_p0)  }
 0x3aa   : > { %v1522_v49 = vpop.permute.xlu0 %1521  ;;  %2113 = vst [vmem:[%s5113_s30 + $0x188] sm:$0xff] (%p4034_p0), %v2112_v21  }
 0x3ab   : > { %3186 = vst.msk [vmem:[%s4475_s3 + $0x40] sm:$0xf] %vm1214_vm0, %v1522_v49  ;;  %v2116_v49 = vld [vmem:[%s4295_s13 + $0xd0] sm:$0xff] (%p4034_p0)  }
 0x3ac   : > { %v1918_v44 = vpop.permute.xlu1 %1917  ;;  %2117 = vst [vmem:[%s5113_s30 + $0x190] sm:$0xff] (%p4034_p0), %v2116_v49  }
 0x3ad   : > { %3285 = vst.msk [vmem:[%s4475_s3 + $0xcc] sm:$0xf] %vm1214_vm0, %v1918_v44  ;;  %v2120_v44 = vld [vmem:[%s4295_s13 + $0xd8] sm:$0xff] (%p4034_p0)  }
 0x3ae   : > { %v1538_v45 = vpop.permute.xlu0 %1537  ;;  %2121 = vst [vmem:[%s5113_s30 + $0x198] sm:$0xff] (%p4034_p0), %v2120_v44  }
 0x3af   : > { %3194 = vst.msk [vmem:[%s4475_s3 + $0x60] sm:$0xf] %vm1214_vm0, %v1538_v45  ;;  %v2124_v45 = vld [vmem:[%s4295_s13 + $0xe0] sm:$0xff] (%p4034_p0)  }
 0x3b0   : > { %v1934_v13 = vpop.permute.xlu1 %1933  ;;  %2125 = vst [vmem:[%s5113_s30 + $0x1a0] sm:$0xff] (%p4034_p0), %v2124_v45  }
 0x3b1   : > { %3293 = vst.msk [vmem:[%s4475_s3 + $0xec] sm:$0xf] %vm1214_vm0, %v1934_v13  ;;  %v2128_v13 = vld [vmem:[%s4295_s13 + $0xe8] sm:$0xff] (%p4034_p0)  }
 0x3b2   : > { %v1717_v25 = vpop.permute.xlu0 %1716  ;;  %2129 = vst [vmem:[%s5113_s30 + $0x1a8] sm:$0xff] (%p4034_p0), %v2128_v13  }
 0x3b3   : > { %3234 = vst.msk [vmem:[%s4475_s3 + $0x80] sm:$0xf] %vm1214_vm0, %v1717_v25  ;;  %v2132_v25 = vld [vmem:[%s4295_s13 + $0xf0] sm:$0xff] (%p4034_p0)  }
 0x3b4   : > { %v1524_v9 = vpop.permute.xlu1 %1523  ;;  %2133 = vst [vmem:[%s5113_s30 + $0x1b0] sm:$0xff] (%p4034_p0), %v2132_v25  }
 0x3b5   : > { %3187 = vst.msk [vmem:[%s4475_s3 + $0x44] sm:$0xf] %vm1214_vm0, %v1524_v9  ;;  %v2136_v9 = vld [vmem:[%s4295_s13 + $0xf8] sm:$0xff] (%p4034_p0)  }
 0x3b6   : > { %v1733_v24 = vpop.permute.xlu0 %1732  ;;  %2137 = vst [vmem:[%s5113_s30 + $0x1b8] sm:$0xff] (%p4034_p0), %v2136_v9  }
 0x3b7   : > { %3242 = vst.msk [vmem:[%s4475_s3 + $0xa0] sm:$0xf] %vm1214_vm0, %v1733_v24 }
 0x3b8   : > { %v1540_v22 = vpop.permute.xlu1 %1539 }
 0x3b9   : > { %3195 = vst.msk [vmem:[%s4475_s3 + $0x64] sm:$0xf] %vm1214_vm0, %v1540_v22 }
 0x3ba   : > { %v1912_v54 = vpop.permute.xlu0 %1911 }
 0x3bb   : > { %3282 = vst.msk [vmem:[%s4475_s3 + $0xc0] sm:$0xf] %vm1214_vm0, %v1912_v54 }
 0x3bc   : > { %v1719_v23 = vpop.permute.xlu1 %1718 }
 0x3bd   : > { %3235 = vst.msk [vmem:[%s4475_s3 + $0x84] sm:$0xf] %vm1214_vm0, %v1719_v23 }
 0x3be   : > { %v1928_v12 = vpop.permute.xlu0 %1927 }
 0x3bf   : > { %3290 = vst.msk [vmem:[%s4475_s3 + $0xe0] sm:$0xf] %vm1214_vm0, %v1928_v12 }
 0x3c0   : > { %v1735_v26 = vpop.permute.xlu1 %1734 }
 0x3c1   : > { %3243 = vst.msk [vmem:[%s4475_s3 + $0xa4] sm:$0xf] %vm1214_vm0, %v1735_v26 }
 0x3c2   : > { %v1534_v33 = vpop.permute.xlu0 %1533 }
 0x3c3   : > { %3192 = vst.msk [vmem:[%s4475_s3 + $0x58] sm:$0xf] %vm1214_vm0, %v1534_v33 }
 0x3c4   : > { %v1914_v20 = vpop.permute.xlu1 %1913 }
 0x3c5   : > { %3283 = vst.msk [vmem:[%s4475_s3 + $0xc4] sm:$0xf] %vm1214_vm0, %v1914_v20 }
 0x3c6   : > { %v1550_v34 = vpop.permute.xlu0 %1549 }
 0x3c7   : > { %3200 = vst.msk [vmem:[%s4475_s3 + $0x78] sm:$0xf] %vm1214_vm0, %v1550_v34 }
 0x3c8   : > { %v1930_v15 = vpop.permute.xlu1 %1929 }
 0x3c9   : > { %3291 = vst.msk [vmem:[%s4475_s3 + $0xe4] sm:$0xf] %vm1214_vm0, %v1930_v15 }
 0x3ca   : > { %v1729_v55 = vpop.permute.xlu0 %1728 }
 0x3cb   : > { %3240 = vst.msk [vmem:[%s4475_s3 + $0x98] sm:$0xf] %vm1214_vm0, %v1729_v55 }
 0x3cc   : > { %v1536_v0 = vpop.permute.xlu1 %1535 }
 0x3cd   : > { %3193 = vst.msk [vmem:[%s4475_s3 + $0x5c] sm:$0xf] %vm1214_vm0, %v1536_v0 }
 0x3ce   : > { %v1745_v2 = vpop.permute.xlu0 %1744 }
 0x3cf   : > { %3248 = vst.msk [vmem:[%s4475_s3 + $0xb8] sm:$0xf] %vm1214_vm0, %v1745_v2 }
 0x3d0   : > { %v1552_v40 = vpop.permute.xlu1 %1551 }
 0x3d1   : > { %3201 = vst.msk [vmem:[%s4475_s3 + $0x7c] sm:$0xf] %vm1214_vm0, %v1552_v40 }
 0x3d2   : > { %v1924_v31 = vpop.permute.xlu0 %1923 }
 0x3d3   : > { %3288 = vst.msk [vmem:[%s4475_s3 + $0xd8] sm:$0xf] %vm1214_vm0, %v1924_v31 }
 0x3d4   : > { %v1731_v42 = vpop.permute.xlu1 %1730 }
 0x3d5   : > { %3241 = vst.msk [vmem:[%s4475_s3 + $0x9c] sm:$0xf] %vm1214_vm0, %v1731_v42 }
 0x3d6   : > { %v1530_v28 = vpop.permute.xlu0 %1529 }
 0x3d7   : > { %3190 = vst.msk [vmem:[%s4475_s3 + $0x50] sm:$0xf] %vm1214_vm0, %v1530_v28 }
 0x3d8   : > { %v1747_v46 = vpop.permute.xlu1 %1746 }
 0x3d9   : > { %3249 = vst.msk [vmem:[%s4475_s3 + $0xbc] sm:$0xf] %vm1214_vm0, %v1747_v46 }
 0x3da   : > { %v1546_v41 = vpop.permute.xlu0 %1545 }
 0x3db   : > { %3198 = vst.msk [vmem:[%s4475_s3 + $0x70] sm:$0xf] %vm1214_vm0, %v1546_v41 }
 0x3dc   : > { %v1926_v50 = vpop.permute.xlu1 %1925 }
 0x3dd   : > { %3289 = vst.msk [vmem:[%s4475_s3 + $0xdc] sm:$0xf] %vm1214_vm0, %v1926_v50 }
 0x3de   : > { %v1725_v43 = vpop.permute.xlu0 %1724 }
 0x3df   : > { %3238 = vst.msk [vmem:[%s4475_s3 + $0x90] sm:$0xf] %vm1214_vm0, %v1725_v43 }
 0x3e0   : > { %v1532_v11 = vpop.permute.xlu1 %1531 }
 0x3e1   : > { %3191 = vst.msk [vmem:[%s4475_s3 + $0x54] sm:$0xf] %vm1214_vm0, %v1532_v11 }
 0x3e2   : > { %v1741_v48 = vpop.permute.xlu0 %1740 }
 0x3e3   : > { %3246 = vst.msk [vmem:[%s4475_s3 + $0xb0] sm:$0xf] %vm1214_vm0, %v1741_v48 }
 0x3e4   : > { %v1548_v56 = vpop.permute.xlu1 %1547 }
 0x3e5   : > { %3199 = vst.msk [vmem:[%s4475_s3 + $0x74] sm:$0xf] %vm1214_vm0, %v1548_v56 }
 0x3e6   : > { %v1920_v10 = vpop.permute.xlu0 %1919 }
 0x3e7   : > { %3286 = vst.msk [vmem:[%s4475_s3 + $0xd0] sm:$0xf] %vm1214_vm0, %v1920_v10 }
 0x3e8   : > { %v1727_v59 = vpop.permute.xlu1 %1726 }
 0x3e9   : > { %3239 = vst.msk [vmem:[%s4475_s3 + $0x94] sm:$0xf] %vm1214_vm0, %v1727_v59 }
 0x3ea   : > { %v1936_v61 = vpop.permute.xlu0 %1935 }
 0x3eb   : > { %3294 = vst.msk [vmem:[%s4475_s3 + $0xf0] sm:$0xf] %vm1214_vm0, %v1936_v61 }
 0x3ec   : > { %v1743_v63 = vpop.permute.xlu1 %1742 }
 0x3ed   : > { %3247 = vst.msk [vmem:[%s4475_s3 + $0xb4] sm:$0xf] %vm1214_vm0, %v1743_v63 }
 0x3ee   : > { %v1940_v4 = vpop.permute.xlu0 %1939 }
 0x3ef   : > { %3296 = vst.msk [vmem:[%s4475_s3 + $0xf8] sm:$0xf] %vm1214_vm0, %v1940_v4 }
 0x3f0   : > { %v1922_v29 = vpop.permute.xlu1 %1921 }
 0x3f1   : > { %3287 = vst.msk [vmem:[%s4475_s3 + $0xd4] sm:$0xf] %vm1214_vm0, %v1922_v29 }
 0x3f4   : > { %v1938_v57 = vpop.permute.xlu1 %1937 }
 0x3f5   : > { %3295 = vst.msk [vmem:[%s4475_s3 + $0xf4] sm:$0xf] %vm1214_vm0, %v1938_v57  ;;  %1990 = sbr.rel (!%p4034_p0) target bundleno = 1018 (0x3fa), region = 64 }
 0x3f8   : > { %v1942_v36 = vpop.permute.xlu1 %1941 }
 0x3f9   : > { %3297 = vst.msk [vmem:[%s4475_s3 + $0xfc] sm:$0xf] %vm1214_vm0, %v1942_v36 }
 0x3fa PF: > { %2291 = sbr.rel (!%p4034_p0) target bundleno = 1045 (0x415), region = 105  ;;  %s5378_s9 = sld [smem:[#allocation15_spill]] (%p4034_p0)  ;;  %v2313_v24 = vld [vmem:[%s4287_s26] sm:$0xff] (%p4034_p0)   ;;  %v2317_v22 = vld [vmem:[%s4287_s26 + $0x8] sm:$0xff] (%p4034_p0)   ;;  %v2321_v54 = vld [vmem:[%s4287_s26 + $0x10] sm:$0xff] (%p4034_p0)  }
 0x3fb   : > { %s5379_s14 = sld [smem:[#allocation16_spill]] (%p4034_p0)  ;;  %v2325_v23 = vld [vmem:[%s4287_s26 + $0x18] sm:$0xff] (%p4034_p0)   ;;  %v2329_v12 = vld [vmem:[%s4287_s26 + $0x20] sm:$0xff] (%p4034_p0)   ;;  %v2333_v26 = vld [vmem:[%s4287_s26 + $0x28] sm:$0xff] (%p4034_p0)  }
 0x3fc   : > { %v2337_v33 = vld [vmem:[%s4287_s26 + $0x30] sm:$0xff] (%p4034_p0)   ;;  %v2341_v20 = vld [vmem:[%s4287_s26 + $0x38] sm:$0xff] (%p4034_p0)   ;;  %v2345_v34 = vld [vmem:[%s4287_s26 + $0x40] sm:$0xff] (%p4034_p0)   ;;  %s5380_s4 = sld [smem:[#allocation22_spill]] (%p4034_p0) }
 0x3fd   : > { %v2349_v15 = vld [vmem:[%s4287_s26 + $0x48] sm:$0xff] (%p4034_p0)   ;;  %v2353_v55 = vld [vmem:[%s4287_s26 + $0x50] sm:$0xff] (%p4034_p0)   ;;  %v2357_v0 = vld [vmem:[%s4287_s26 + $0x58] sm:$0xff] (%p4034_p0)  }
 0x3fe   : > { %v2361_v2 = vld [vmem:[%s4287_s26 + $0x60] sm:$0xff] (%p4034_p0)   ;;  %v2365_v40 = vld [vmem:[%s4287_s26 + $0x68] sm:$0xff] (%p4034_p0)   ;;  %v2369_v31 = vld [vmem:[%s4287_s26 + $0x70] sm:$0xff] (%p4034_p0)  }
 0x3ff   : > { %v2373_v42 = vld [vmem:[%s4287_s26 + $0x78] sm:$0xff]   ;;  %v2377_v28 = vld [vmem:[%s4287_s26 + $0x80] sm:$0xff]   ;;  %v2381_v46 = vld [vmem:[%s4287_s26 + $0x88] sm:$0xff]  }
 0x400   : > { %s3304_s16 = sshll.u32 %s5378_s9, 4  ;;  %v2385_v41 = vld [vmem:[%s4287_s26 + $0x90] sm:$0xff]   ;;  %v2389_v50 = vld [vmem:[%s4287_s26 + $0x98] sm:$0xff]   ;;  %v2393_v43 = vld [vmem:[%s4287_s26 + $0xa0] sm:$0xff]  }
 0x401   : > { %s3305_s17 = sshll.u32 %s5379_s14, 7  ;;  %v2397_v11 = vld [vmem:[%s4287_s26 + $0xa8] sm:$0xff]   ;;  %v2401_v48 = vld [vmem:[%s4287_s26 + $0xb0] sm:$0xff]   ;;  %v2405_v56 = vld [vmem:[%s4287_s26 + $0xb8] sm:$0xff]  }
 0x402   : > { %s2294_s27 = sadd.s32 %s3305_s17, %s3304_s16  ;;  %v2409_v10 = vld [vmem:[%s4287_s26 + $0xc0] sm:$0xff]   ;;  %v2413_v59 = vld [vmem:[%s4287_s26 + $0xc8] sm:$0xff]   ;;  %v2417_v61 = vld [vmem:[%s4287_s26 + $0xd0] sm:$0xff]  }
 0x403   : > { %s3306_s13 = sshll.u32 %s2294_s27, 2  ;;  %v2421_v63 = vld [vmem:[%s4287_s26 + $0xd8] sm:$0xff]   ;;  %v2425_v4 = vld [vmem:[%s4287_s26 + $0xe0] sm:$0xff]   ;;  %v2429_v29 = vld [vmem:[%s4287_s26 + $0xe8] sm:$0xff]  }
 0x404   : > { %s5186_s5 = scalar_lea.vmem %s5380_s4, %s3306_s13  ;;  %v2433_v57 = vld [vmem:[%s4287_s26 + $0xf0] sm:$0xff]   ;;  %v2437_v36 = vld [vmem:[%s4287_s26 + $0xf8] sm:$0xff]  }
 0x405   : > { %2314 = vst [vmem:[%s5186_s5] sm:$0xff] %v2313_v24   ;;  %2318 = vst [vmem:[%s5186_s5 + $0x8] sm:$0xff] %v2317_v22  }
 0x406   : > { %2322 = vst [vmem:[%s5186_s5 + $0x10] sm:$0xff] %v2321_v54   ;;  %2326 = vst [vmem:[%s5186_s5 + $0x18] sm:$0xff] %v2325_v23  }
 0x407   : > { %2330 = vst [vmem:[%s5186_s5 + $0x20] sm:$0xff] %v2329_v12   ;;  %2334 = vst [vmem:[%s5186_s5 + $0x28] sm:$0xff] %v2333_v26  }
 0x408   : > { %2338 = vst [vmem:[%s5186_s5 + $0x30] sm:$0xff] %v2337_v33   ;;  %2342 = vst [vmem:[%s5186_s5 + $0x38] sm:$0xff] %v2341_v20  }
 0x409   : > { %2346 = vst [vmem:[%s5186_s5 + $0x80] sm:$0xff] %v2345_v34   ;;  %2350 = vst [vmem:[%s5186_s5 + $0x88] sm:$0xff] %v2349_v15  }
 0x40a   : > { %2354 = vst [vmem:[%s5186_s5 + $0x90] sm:$0xff] %v2353_v55   ;;  %2358 = vst [vmem:[%s5186_s5 + $0x98] sm:$0xff] %v2357_v0  }
 0x40b   : > { %2362 = vst [vmem:[%s5186_s5 + $0xa0] sm:$0xff] %v2361_v2   ;;  %2366 = vst [vmem:[%s5186_s5 + $0xa8] sm:$0xff] %v2365_v40  }
 0x40c   : > { %2370 = vst [vmem:[%s5186_s5 + $0xb0] sm:$0xff] %v2369_v31   ;;  %2374 = vst [vmem:[%s5186_s5 + $0xb8] sm:$0xff] %v2373_v42  }
 0x40d   : > { %2378 = vst [vmem:[%s5186_s5 + $0x100] sm:$0xff] %v2377_v28   ;;  %2382 = vst [vmem:[%s5186_s5 + $0x108] sm:$0xff] %v2381_v46  }
 0x40e   : > { %2386 = vst [vmem:[%s5186_s5 + $0x110] sm:$0xff] %v2385_v41   ;;  %2390 = vst [vmem:[%s5186_s5 + $0x118] sm:$0xff] %v2389_v50  }
 0x40f   : > { %2394 = vst [vmem:[%s5186_s5 + $0x120] sm:$0xff] %v2393_v43   ;;  %2398 = vst [vmem:[%s5186_s5 + $0x128] sm:$0xff] %v2397_v11  }
 0x410   : > { %2402 = vst [vmem:[%s5186_s5 + $0x130] sm:$0xff] %v2401_v48   ;;  %2406 = vst [vmem:[%s5186_s5 + $0x138] sm:$0xff] %v2405_v56  }
 0x411   : > { %2410 = vst [vmem:[%s5186_s5 + $0x180] sm:$0xff] %v2409_v10   ;;  %2414 = vst [vmem:[%s5186_s5 + $0x188] sm:$0xff] %v2413_v59  }
 0x412   : > { %2418 = vst [vmem:[%s5186_s5 + $0x190] sm:$0xff] %v2417_v61   ;;  %2422 = vst [vmem:[%s5186_s5 + $0x198] sm:$0xff] %v2421_v63  }
 0x413   : > { %2426 = vst [vmem:[%s5186_s5 + $0x1a0] sm:$0xff] %v2425_v4   ;;  %2430 = vst [vmem:[%s5186_s5 + $0x1a8] sm:$0xff] %v2429_v29  }
 0x414   : > { %2434 = vst [vmem:[%s5186_s5 + $0x1b0] sm:$0xff] %v2433_v57   ;;  %2438 = vst [vmem:[%s5186_s5 + $0x1b8] sm:$0xff] %v2437_v36  }
 0x415 PF: > { %2592 = sbr.rel (!%p4034_p0) target bundleno = 1072 (0x430), region = 146  ;;  %s5381_s20 = sld [smem:[#allocation15_spill]] (%p4034_p0)  ;;  %v2614_v6 = vld [vmem:[%s4475_s3] sm:$0xff] (%p4034_p0)   ;;  %v2618_v62 = vld [vmem:[%s4475_s3 + $0x8] sm:$0xff] (%p4034_p0)   ;;  %v2622_v52 = vld [vmem:[%s4475_s3 + $0x10] sm:$0xff] (%p4034_p0)  }
 0x416   : > { %s5382_s6 = sld [smem:[#allocation16_spill]] (%p4034_p0)  ;;  %v2626_v8 = vld [vmem:[%s4475_s3 + $0x18] sm:$0xff] (%p4034_p0)   ;;  %v2630_v53 = vld [vmem:[%s4475_s3 + $0x20] sm:$0xff] (%p4034_p0)   ;;  %v2634_v18 = vld [vmem:[%s4475_s3 + $0x28] sm:$0xff] (%p4034_p0)  }
 0x417   : > { %v2638_v37 = vld [vmem:[%s4475_s3 + $0x30] sm:$0xff] (%p4034_p0)   ;;  %v2642_v47 = vld [vmem:[%s4475_s3 + $0x38] sm:$0xff] (%p4034_p0)   ;;  %v2646_v5 = vld [vmem:[%s4475_s3 + $0x40] sm:$0xff] (%p4034_p0)   ;;  %s5383_s19 = sld [smem:[#allocation23_spill]] (%p4034_p0) }
 0x418   : > { %v2650_v19 = vld [vmem:[%s4475_s3 + $0x48] sm:$0xff] (%p4034_p0)   ;;  %v2654_v30 = vld [vmem:[%s4475_s3 + $0x50] sm:$0xff] (%p4034_p0)   ;;  %v2658_v38 = vld [vmem:[%s4475_s3 + $0x58] sm:$0xff] (%p4034_p0)  }
 0x419   : > { %v2662_v27 = vld [vmem:[%s4475_s3 + $0x60] sm:$0xff] (%p4034_p0)   ;;  %v2666_v58 = vld [vmem:[%s4475_s3 + $0x68] sm:$0xff] (%p4034_p0)   ;;  %v2670_v51 = vld [vmem:[%s4475_s3 + $0x70] sm:$0xff] (%p4034_p0)  }
 0x41a   : > { %v2674_v14 = vld [vmem:[%s4475_s3 + $0x78] sm:$0xff]   ;;  %v2678_v60 = vld [vmem:[%s4475_s3 + $0x80] sm:$0xff]   ;;  %v2682_v32 = vld [vmem:[%s4475_s3 + $0x88] sm:$0xff]  }
 0x41b   : > { %s3307_s26 = sshll.u32 %s5381_s20, 4  ;;  %v2686_v35 = vld [vmem:[%s4475_s3 + $0x90] sm:$0xff]   ;;  %v2690_v39 = vld [vmem:[%s4475_s3 + $0x98] sm:$0xff]   ;;  %v2694_v7 = vld [vmem:[%s4475_s3 + $0xa0] sm:$0xff]  }
 0x41c   : > { %s3308_s7 = sshll.u32 %s5382_s6, 7  ;;  %v2698_v1 = vld [vmem:[%s4475_s3 + $0xa8] sm:$0xff]   ;;  %v2702_v3 = vld [vmem:[%s4475_s3 + $0xb0] sm:$0xff]   ;;  %v2706_v17 = vld [vmem:[%s4475_s3 + $0xb8] sm:$0xff]  }
 0x41d   : > { %s2595_s24 = sadd.s32 %s3308_s7, %s3307_s26  ;;  %v2710_v16 = vld [vmem:[%s4475_s3 + $0xc0] sm:$0xff]   ;;  %v2714_v21 = vld [vmem:[%s4475_s3 + $0xc8] sm:$0xff]   ;;  %v2718_v49 = vld [vmem:[%s4475_s3 + $0xd0] sm:$0xff]  }
 0x41e   : > { %s3309_s8 = sshll.u32 %s2595_s24, 2  ;;  %v2722_v44 = vld [vmem:[%s4475_s3 + $0xd8] sm:$0xff]   ;;  %v2726_v45 = vld [vmem:[%s4475_s3 + $0xe0] sm:$0xff]   ;;  %v2730_v13 = vld [vmem:[%s4475_s3 + $0xe8] sm:$0xff]  }
 0x41f   : > { %s5259_s30 = scalar_lea.vmem %s5383_s19, %s3309_s8  ;;  %v2734_v25 = vld [vmem:[%s4475_s3 + $0xf0] sm:$0xff]   ;;  %v2738_v9 = vld [vmem:[%s4475_s3 + $0xf8] sm:$0xff]  }
 0x420   : > { %2615 = vst [vmem:[%s5259_s30] sm:$0xff] %v2614_v6   ;;  %2619 = vst [vmem:[%s5259_s30 + $0x8] sm:$0xff] %v2618_v62  }
 0x421   : > { %2623 = vst [vmem:[%s5259_s30 + $0x10] sm:$0xff] %v2622_v52   ;;  %2627 = vst [vmem:[%s5259_s30 + $0x18] sm:$0xff] %v2626_v8  }
 0x422   : > { %2631 = vst [vmem:[%s5259_s30 + $0x20] sm:$0xff] %v2630_v53   ;;  %2635 = vst [vmem:[%s5259_s30 + $0x28] sm:$0xff] %v2634_v18  }
 0x423   : > { %2639 = vst [vmem:[%s5259_s30 + $0x30] sm:$0xff] %v2638_v37   ;;  %2643 = vst [vmem:[%s5259_s30 + $0x38] sm:$0xff] %v2642_v47  }
 0x424   : > { %2647 = vst [vmem:[%s5259_s30 + $0x80] sm:$0xff] %v2646_v5   ;;  %2651 = vst [vmem:[%s5259_s30 + $0x88] sm:$0xff] %v2650_v19  }
 0x425   : > { %2655 = vst [vmem:[%s5259_s30 + $0x90] sm:$0xff] %v2654_v30   ;;  %2659 = vst [vmem:[%s5259_s30 + $0x98] sm:$0xff] %v2658_v38  }
 0x426   : > { %2663 = vst [vmem:[%s5259_s30 + $0xa0] sm:$0xff] %v2662_v27   ;;  %2667 = vst [vmem:[%s5259_s30 + $0xa8] sm:$0xff] %v2666_v58  }
 0x427   : > { %2671 = vst [vmem:[%s5259_s30 + $0xb0] sm:$0xff] %v2670_v51   ;;  %2675 = vst [vmem:[%s5259_s30 + $0xb8] sm:$0xff] %v2674_v14  }
 0x428   : > { %2679 = vst [vmem:[%s5259_s30 + $0x100] sm:$0xff] %v2678_v60   ;;  %2683 = vst [vmem:[%s5259_s30 + $0x108] sm:$0xff] %v2682_v32  }
 0x429   : > { %2687 = vst [vmem:[%s5259_s30 + $0x110] sm:$0xff] %v2686_v35   ;;  %2691 = vst [vmem:[%s5259_s30 + $0x118] sm:$0xff] %v2690_v39  }
 0x42a   : > { %2695 = vst [vmem:[%s5259_s30 + $0x120] sm:$0xff] %v2694_v7   ;;  %2699 = vst [vmem:[%s5259_s30 + $0x128] sm:$0xff] %v2698_v1  }
 0x42b   : > { %2703 = vst [vmem:[%s5259_s30 + $0x130] sm:$0xff] %v2702_v3   ;;  %2707 = vst [vmem:[%s5259_s30 + $0x138] sm:$0xff] %v2706_v17  }
 0x42c   : > { %2711 = vst [vmem:[%s5259_s30 + $0x180] sm:$0xff] %v2710_v16   ;;  %2715 = vst [vmem:[%s5259_s30 + $0x188] sm:$0xff] %v2714_v21  }
 0x42d   : > { %2719 = vst [vmem:[%s5259_s30 + $0x190] sm:$0xff] %v2718_v49   ;;  %2723 = vst [vmem:[%s5259_s30 + $0x198] sm:$0xff] %v2722_v44  }
 0x42e   : > { %2727 = vst [vmem:[%s5259_s30 + $0x1a0] sm:$0xff] %v2726_v45   ;;  %2731 = vst [vmem:[%s5259_s30 + $0x1a8] sm:$0xff] %v2730_v13  }
 0x42f   : > { %2735 = vst [vmem:[%s5259_s30 + $0x1b0] sm:$0xff] %v2734_v25   ;;  %2739 = vst [vmem:[%s5259_s30 + $0x1b8] sm:$0xff] %v2738_v9  }
 0x430 PF: > { %s24_s12 = sadd.s32 1, %s3865_s12   ;;  %s5384_s14 = sld [smem:[#allocation17_spill]] }
 0x431   : > { %p21_p6 = scmp.ge.s32.totalorder %s24_s12, 6   ;;  %s5385_s27 = smov %s3841_s28 }
 0x432   : > { %s5386_s28 = smov %s3845_s29  ;;  %s5387_s29 = smov %s4047_s22 }
 0x433   : > { %s5388_s30 = smov %s3857_s10  ;;  %s5389_s9 = smov %s3861_s11 }
 0x434   : > { %s5391_s11 = smov %s5397_s18  ;;  %23 = sbr.rel (!%p21_p6) target bundleno = 14 (0xe), region = 252 }
 0x436   : > { %s5390_s10 = smov %s5384_s14 }
 0x439   :  { %2917 = vsyncpa [#allocation3], 1 }
 0x43a   :  { %2919 = vsyncpa [#allocation3 + $0x1], 1 }
 0x43b   :  { %2920 = vsyncpa [#allocation5], 1 }
 0x43c   :  { %2921 = vsyncpa [#allocation8], 1 }

</bundles_post_ra>
